<compile_context>
chip_gen: v7x
topology: tpu7x:2x2x1
jax: 0.10.0
libtpu: 0.0.40
codegen_flags: <defaults>
</compile_context>

<pallas_src>
import functools

import jax
import jax.numpy as jnp
from jax.experimental import pallas as pl
from jax.experimental.pallas import tpu as pltpu

NUM_CLASSES = 80
BN_EPS = 1e-5
SPATIAL_SCALE = 0.0625
ROI_RES = 7
ROI_BINS_PAD = 56          # 49 RoIAlign bins padded (duplicated rows) to a sublane multiple
ROI_BLOCK = 4              # same-image ROIs processed per kernel-2 grid step


def _vmem_limit_bytes():
    """v5e/v6e have 128 MiB physical VMEM -> allow ~100 MiB; v7x has 64 MiB -> 48 MiB."""
    try:
        cap = int(pltpu.get_tpu_info().vmem_capacity_bytes)
    except Exception:
        return 48 * 1024 * 1024
    return min(cap - 16 * 1024 * 1024, 100 * 1024 * 1024)


# ----------------------------------------------------------------------------
# Kernel 1: fused conv(im2col matmul) + BN(folded) + ReLU + MaxPool3d + temporal mean
# ----------------------------------------------------------------------------
def _stem_kernel(p_ref, w_ref, b_ref, o_ref, acc_ref, *, hch, wp, wq, t_total):
    t = pl.program_id(2)

    conv = jnp.dot(p_ref[0, 0, 0], w_ref[...], preferred_element_type=jnp.float32)
    y = jnp.maximum(conv + b_ref[...], 0.0)                # (R, C), R = 4*(hch+1)*wq

    c = y.shape[-1]
    y4 = y.reshape(4, hch + 1, wq, c)                      # parity blocks [2*a+b, n, m, c]
    p00, p01, p10, p11 = y4[0], y4[1], y4[2], y4[3]
    # pooled(i, j) = max over conv rows {2i-1, 2i, 2i+1} x cols {2j-1, 2j, 2j+1}
    # (edge-clamped duplicates fall inside the window, so the max is exact).
    # NOTE: the +1-shifted sublane slices could be pltpu.roll if the MLIR shows retile copies.
    mx = p00[:hch, :wp]
    mx = jnp.maximum(mx, p01[:hch, :wp])
    mx = jnp.maximum(mx, p01[:hch, 1:wp + 1])
    mx = jnp.maximum(mx, p10[:hch, :wp])
    mx = jnp.maximum(mx, p10[1:hch + 1, :wp])
    mx = jnp.maximum(mx, p11[:hch, :wp])
    mx = jnp.maximum(mx, p11[:hch, 1:wp + 1])
    mx = jnp.maximum(mx, p11[1:hch + 1, :wp])
    mx = jnp.maximum(mx, p11[1:hch + 1, 1:wp + 1])
    mx = mx.reshape(hch * wp, c)

    @pl.when(t == 0)
    def _():
        acc_ref[...] = jnp.zeros_like(acc_ref)

    acc_ref[...] += mx                                     # temporal accumulation

    @pl.when(t == t_total - 1)
    def _():
        # AvgPool3d((T,1,1)); emit bf16 so kernel 2's per-image feature DMA is halved.
        o_ref[0, 0] = (acc_ref[...] * (1.0 / t_total)).astype(o_ref.dtype)


def stem_forward(patches, w_mat, bias, *, hch, wp, wq):
    B, T, NC, R, KP = patches.shape
    C = w_mat.shape[1]
    kernel = functools.partial(_stem_kernel, hch=hch, wp=wp, wq=wq, t_total=T)
    out = pl.pallas_call(
        kernel,
        out_shape=jax.ShapeDtypeStruct((B, NC, hch * wp, C), jnp.bfloat16),
        grid_spec=pltpu.PrefetchScalarGridSpec(
            num_scalar_prefetch=0,
            grid=(B, NC, T),
            in_specs=[
                pl.BlockSpec((1, 1, 1, R, KP), lambda b, c, t: (b, t, c, 0, 0)),
                pl.BlockSpec((KP, C), lambda b, c, t: (0, 0)),
                pl.BlockSpec((1, C), lambda b, c, t: (0, 0)),
            ],
            out_specs=pl.BlockSpec((1, 1, hch * wp, C), lambda b, c, t: (b, c, 0, 0)),
            scratch_shapes=[pltpu.VMEM((hch * wp, C), jnp.float32)],
        ),
        compiler_params=pltpu.CompilerParams(
            dimension_semantics=("parallel", "parallel", "arbitrary"),
            vmem_limit_bytes=_vmem_limit_bytes()),
    )(patches, w_mat, bias)
    return out.reshape(B, NC * hch * wp, C)                # (B, Hp*Wp, C) bf16


# ----------------------------------------------------------------------------
# Kernel 2: batched RoIAlign (interp-matrix matmul) + per-ROI bin max + fused Linear
# ----------------------------------------------------------------------------
def _roi_head_kernel(simg_ref, wroi_ref, feat_ref, pw_ref, pb_ref, o_ref, *, g, p):
    del simg_ref  # consumed only by the feat index_map
    bins = jnp.dot(wroi_ref[0], feat_ref[0], preferred_element_type=jnp.float32)   # (g*p, C)
    # Segmented MaxPool2d((7,7)): max over each ROI's 56 (padded, duplicate-safe) bin rows.
    pooled = jnp.concatenate(
        [jnp.max(bins[i * p:(i + 1) * p, :], axis=0, keepdims=True) for i in range(g)],
        axis=0)                                                                    # (g, C)
    # Fused Linear (Dropout is identity in eval; AdaptiveAvgPool3d(1) on 1x1x1 is identity).
    o_ref[0] = jnp.dot(pooled, pw_ref[...], preferred_element_type=jnp.float32) + pb_ref[...]


def roi_head(step_img, w_steps, feat, proj_w_pad, proj_b_pad, *, g, p):
    S, GP, HW = w_steps.shape
    _, HW2, C = feat.shape
    assert HW == HW2 and GP == g * p
    NCp = proj_w_pad.shape[1]
    out = pl.pallas_call(
        functools.partial(_roi_head_kernel, g=g, p=p),
        out_shape=jax.ShapeDtypeStruct((S, g, NCp), jnp.float32),
        grid_spec=pltpu.PrefetchScalarGridSpec(
            num_scalar_prefetch=1,
            grid=(S,),
            in_specs=[
                pl.BlockSpec((1, GP, HW), lambda s, simg: (s, 0, 0)),
                pl.BlockSpec((1, HW, C), lambda s, simg: (simg[s], 0, 0)),
                pl.BlockSpec((C, NCp), lambda s, simg: (0, 0)),      # resident proj weights
                pl.BlockSpec((1, NCp), lambda s, simg: (0, 0)),
            ],
            out_specs=pl.BlockSpec((1, g, NCp), lambda s, simg: (s, 0, 0)),
        ),
        compiler_params=pltpu.CompilerParams(
            dimension_semantics=("parallel",),
            vmem_limit_bytes=_vmem_limit_bytes()),
    )(step_img, w_steps, feat, proj_w_pad, proj_b_pad)
    return out.reshape(S * g, NCp)


# ----------------------------------------------------------------------------
# JAX glue: parity/chunk-ordered im2col patches, RoIAlign weights, ROI block packing
# ----------------------------------------------------------------------------
def build_stem_patches(x_nthwc, Ho, Wo, hch, n_chunks, Wq):
    """im2col for the 7x7/s2 conv; rows ordered per row-chunk as 4 (row-parity, col-parity)
    blocks P[a,b][n,m] = conv pixel (clip(2(n)-a), clip(2m-b)) so the fused kernel's 3x3/s2
    max pool reduces to contiguous static slices.  Edge-clamped duplicates fall inside the
    pooling window (or are never read), so the max is exact."""
    B, T, H, W, Cin = x_nthwc.shape
    xp = jnp.pad(x_nthwc, ((0, 0), (0, 0), (3, 3), (3, 3), (0, 0)))
    xp = xp.reshape(B * T, H + 6, W + 6, Cin)

    a = jnp.arange(2).reshape(2, 1, 1)
    ch = jnp.arange(n_chunks).reshape(1, n_chunks, 1)
    n = jnp.arange(hch + 1).reshape(1, 1, hch + 1)
    ho = jnp.clip(2 * (ch * hch + n) - a, 0, Ho - 1)           # (2, NC, hch+1) conv-row index
    bpar = jnp.arange(2).reshape(2, 1)
    m = jnp.arange(Wq).reshape(1, Wq)
    wo = jnp.clip(2 * m - bpar, 0, Wo - 1)                     # (2, Wq)        conv-col index
    rows = 2 * ho[..., None] + jnp.arange(7)                   # (2, NC, hch+1, 7) padded rows
    cols = 2 * wo[..., None] + jnp.arange(7)                   # (2, Wq, 7)        padded cols

    R = rows[:, :, :, :, None, None, None]
    Cc = cols[None, None, None, None, :, :, :]
    g = xp[:, R, Cc, :]        # (B*T, a, NC, n, dh, b, m, dw, Cin)
    g = g.transpose(0, 2, 1, 5, 3, 6, 4, 7, 8)                 # -> (BT, NC, a, b, n, m, dh, dw, Cin)
    patches = g.reshape(B, T, n_chunks, 4 * (hch + 1) * Wq, 7 * 7 * Cin)
    return patches.astype(jnp.bfloat16)


def roi_align_weight_matrix(boxes, Hf, Wf, out_h, out_w, spatial_scale, max_grid=8):
    """Dense interpolation weights reproducing torchvision RoIAlign (sampling_ratio=0 =>
    adaptive grid, aligned=False), built with a scatter-add (no dense one_hot intermediate).
    Output: (K, out_h*out_w, Hf*Wf) float32."""
    K = boxes.shape[0]
    x1 = boxes[:, 1] * spatial_scale
    y1 = boxes[:, 2] * spatial_scale
    x2 = boxes[:, 3] * spatial_scale
    y2 = boxes[:, 4] * spatial_scale
    roi_w = jnp.maximum(x2 - x1, 1.0)
    roi_h = jnp.maximum(y2 - y1, 1.0)
    bin_h = roi_h / out_h
    bin_w = roi_w / out_w
    grid_h = jnp.ceil(roi_h / out_h).astype(jnp.int32)
    grid_w = jnp.ceil(roi_w / out_w).astype(jnp.int32)
    count = jnp.maximum(grid_h * grid_w, 1).astype(jnp.float32)

    def b(arr, axis):
        shape = [1] * 5
        shape[axis] = -1
        return arr.reshape(shape)

    ph = b(jnp.arange(out_h, dtype=jnp.float32), 1)
    pw = b(jnp.arange(out_w, dtype=jnp.float32), 2)
    iy = b(jnp.arange(max_grid, dtype=jnp.float32), 3)
    ix = b(jnp.arange(max_grid, dtype=jnp.float32), 4)
    y1b, x1b = b(y1, 0), b(x1, 0)
    bhb, bwb = b(bin_h, 0), b(bin_w, 0)
    ghb, gwb = b(grid_h.astype(jnp.float32), 0), b(grid_w.astype(jnp.float32), 0)

    y = y1b + ph * bhb + (iy + 0.5) * bhb / ghb
    x = x1b + pw * bwb + (ix + 0.5) * bwb / gwb
    valid = (iy < ghb) & (ix < gwb)
    oob = (y < -1.0) | (y > Hf) | (x < -1.0) | (x > Wf)

    y = jnp.maximum(y, 0.0)
    x = jnp.maximum(x, 0.0)
    y_low = jnp.floor(y).astype(jnp.int32)
    x_low = jnp.floor(x).astype(jnp.int32)
    y_hi_c = y_low >= Hf - 1
    x_hi_c = x_low >= Wf - 1
    y_high = jnp.where(y_hi_c, Hf - 1, y_low + 1)
    x_high = jnp.where(x_hi_c, Wf - 1, x_low + 1)
    y_low = jnp.where(y_hi_c, Hf - 1, y_low)
    x_low = jnp.where(x_hi_c, Wf - 1, x_low)
    y = jnp.where(y_hi_c, y_low.astype(jnp.float32), y)
    x = jnp.where(x_hi_c, x_low.astype(jnp.float32), x)
    ly = y - y_low.astype(jnp.float32)
    lx = x - x_low.astype(jnp.float32)
    hy, hx = 1.0 - ly, 1.0 - lx
    msk = (valid & (~oob)).astype(jnp.float32)

    P = out_h * out_w
    HW = Hf * Wf
    cw = jnp.stack([hy * hx, hy * lx, ly * hx, ly * lx], axis=-1)              # (K,oh,ow,g,g,4)
    ci = jnp.stack([y_low * Wf + x_low, y_low * Wf + x_high,
                    y_high * Wf + x_low, y_high * Wf + x_high], axis=-1)
    cw = (cw * msk[..., None]) / count[:, None, None, None, None, None]
    nupd = max_grid * max_grid * 4
    cw = cw.reshape(K, P, nupd)
    ci = ci.reshape(K, P, nupd)
    k_ids = jnp.arange(K, dtype=jnp.int32)[:, None, None]
    p_ids = jnp.arange(P, dtype=jnp.int32)[None, :, None]
    return jnp.zeros((K, P, HW), jnp.float32).at[k_ids, p_ids, ci].add(cw)


def pack_rois_by_image(batch_idx, num_rois, num_images, group):
    """Pack ROIs into per-image blocks of `group` slots (unused slots get zero weights).
    Returns (slot per original ROI, image index per grid step, static step count)."""
    order = jnp.argsort(batch_idx)
    sorted_b = batch_idx[order]
    counts = jnp.zeros((num_images,), jnp.int32).at[batch_idx].add(1)
    starts = jnp.cumsum(counts) - counts
    rank = jnp.arange(num_rois, dtype=jnp.int32) - starts[sorted_b]
    nblocks = (counts + group - 1) // group
    block_start = jnp.cumsum(nblocks) - nblocks
    slot_sorted = (block_start[sorted_b] + rank // group) * group + rank % group
    slot_of_orig = jnp.zeros((num_rois,), jnp.int32).at[order].set(slot_sorted)

    num_steps = num_rois // group + num_images                 # static upper bound on blocks
    step_img = jnp.searchsorted(jnp.cumsum(nblocks), jnp.arange(num_steps), side="right")
    step_img = jnp.clip(step_img, 0, num_images - 1).astype(jnp.int32)
    return slot_of_orig, step_img, num_steps


# ----------------------------------------------------------------------------
# Full forward pass
# ----------------------------------------------------------------------------
def detection_bbox_forward(x_ncthw, bboxes, params):
    B, Cin, T, H, W = x_ncthw.shape
    assert T == 4, "AvgPool3d((4,1,1)) -> temporal mean assumes T == 4"
    x = jnp.transpose(x_ncthw, (0, 2, 3, 4, 1))               # NCTHW -> NTHWC

    Ho = (H + 2 * 3 - 7) // 2 + 1
    Wo = (W + 2 * 3 - 7) // 2 + 1
    assert Ho % 2 == 0 and Wo % 2 == 0, "fused pool kernel expects even conv output dims"
    Hp, Wp = Ho // 2, Wo // 2
    n_chunks = 2 if Hp % 2 == 0 else 1                        # spatial parallel axis (v7x 2 TCs)
    assert Hp % n_chunks == 0
    hch = Hp // n_chunks
    Wq = ((Wp + 1 + 7) // 8) * 8                              # sublane-aligned parity-block width

    # --- Kernel 1: fused conv + BN + ReLU + MaxPool3d + temporal AvgPool ---
    patches = build_stem_patches(x, Ho, Wo, hch, n_chunks, Wq)        # (B,T,NC,R,147) bf16
    scale = params["gamma"] / jnp.sqrt(params["var"] + BN_EPS)
    w_mat = (params["conv_w"] * scale).reshape(7 * 7 * Cin, 64).astype(jnp.bfloat16)
    bias = (params["beta"] - params["mean"] * scale).reshape(1, 64)
    feat = stem_forward(patches, w_mat, bias, hch=hch, wp=Wp, wq=Wq)  # (B, Hp*Wp, 64) bf16

    # --- ROI block packing: same-image ROIs grouped per grid step for feature DMA reuse ---
    K = bboxes.shape[0]
    batch_idx = bboxes[:, 0].astype(jnp.int32)
    slot_of_orig, step_img, num_steps = pack_rois_by_image(batch_idx, K, B, ROI_BLOCK)
    K_pad = num_steps * ROI_BLOCK
    HW = Hp * Wp

    w_roi = roi_align_weight_matrix(bboxes, Hp, Wp, ROI_RES, ROI_RES, SPATIAL_SCALE)
    pad_rows = jnp.tile(w_roi[:, :1, :], (1, ROI_BINS_PAD - ROI_RES * ROI_RES, 1))
    w_roi = jnp.concatenate([w_roi, pad_rows], axis=1)        # (K, 56, HW), dup rows: max-safe
    w_pad = jnp.zeros((K_pad, ROI_BINS_PAD, HW), jnp.bfloat16)
    w_pad = w_pad.at[slot_of_orig].set(w_roi.astype(jnp.bfloat16))
    w_steps = w_pad.reshape(num_steps, ROI_BLOCK * ROI_BINS_PAD, HW)

    # Projection weights padded N: 80 -> 128 so kernel-2 stores are full 128-lane vst.
    NCp = ((NUM_CLASSES + 127) // 128) * 128
    proj_w_pad = jnp.zeros((64, NCp), jnp.float32).at[:, :NUM_CLASSES].set(params["proj_w"])
    proj_b_pad = jnp.zeros((1, NCp), jnp.float32).at[:, :NUM_CLASSES].set(
        params["proj_b"].reshape(1, -1))

    # --- Kernel 2: RoIAlign matmul + per-ROI bin max + fused Linear ---
    out_pad = roi_head(step_img, w_steps, feat, proj_w_pad, proj_b_pad,
                       g=ROI_BLOCK, p=ROI_BINS_PAD)           # (K_pad, NCp)
    return out_pad[slot_of_orig, :NUM_CLASSES]


def init_params(key):
    ks = jax.random.split(key, 7)
    return {
        "conv_w": jax.random.normal(ks[0], (7, 7, 3, 64), jnp.float32) / jnp.sqrt(147.0),
        "gamma": 1.0 + 0.1 * jax.random.normal(ks[1], (64,), jnp.float32),
        "beta": 0.1 * jax.random.normal(ks[2], (64,), jnp.float32),
        "mean": 0.1 * jax.random.normal(ks[3], (64,), jnp.float32),
        "var": jnp.abs(1.0 + 0.1 * jax.random.normal(ks[4], (64,), jnp.float32)),
        "proj_w": jax.random.normal(ks[5], (64, NUM_CLASSES), jnp.float32) / 8.0,
        "proj_b": 0.01 * jax.random.normal(ks[6], (NUM_CLASSES,), jnp.float32),
    }


if __name__ == "__main__":
    key = jax.random.PRNGKey(0)
    kx, kp = jax.random.split(key)
    B, Cin, T, H, W = 2, 3, 4, 32, 32                 # T=4 so AvgPool3d((4,1,1)) -> temporal dim 1
    x = jax.random.normal(kx, (B, Cin, T, H, W), jnp.float32)
    # bboxes in torchvision (K,5) format: [batch_index, x1, y1, x2, y2] in input-pixel coords
    bboxes = jnp.array([
        [0.0, 8.0, 8.0, 96.0, 96.0],
        [0.0, 16.0, 0.0, 64.0, 120.0],
        [1.0, 0.0, 0.0, 127.0, 127.0],
        [1.0, 32.0, 16.0, 80.0, 112.0],
    ], dtype=jnp.float32)
    params = init_params(kp)

    out = jax.jit(detection_bbox_forward)(x, bboxes, params)
    out = jax.block_until_ready(out)
    assert out.shape == (bboxes.shape[0], NUM_CLASSES), out.shape
    assert bool(jnp.all(jnp.isfinite(out)))
    print("KERNEL_OK")
</pallas_src>

<mosaic_0001>
module attributes {stable_mosaic.version = 11 : i64} {
  func.func private @main(%arg0: i32) attributes {dimension_semantics = [#tpu.dimension_semantics<core_parallel>], iteration_bounds = array<i64: 2>, tpu.core_type = #tpu.core_type<sc_scalar_subcore>, window_params = []} {
    return
  }
}

module attributes {stable_mosaic.version = 11 : i64} {
  func.func private @main(%arg0: i32) attributes {dimension_semantics = [#tpu.dimension_semantics<core_parallel>], iteration_bounds = array<i64: 2>, tpu.core_type = #tpu.core_type<sc_scalar_subcore>, window_params = []} {
    return
  }
}

module attributes {stable_mosaic.version = 11 : i64} {
  func.func @_stem_kernel(%arg0: i32, %arg1: i32, %arg2: i32, %arg3: memref<1x1x1x320x147xbf16, #tpu.memory_space<vmem>>, %arg4: memref<147x64xbf16, #tpu.memory_space<vmem>>, %arg5: memref<1x64xf32, #tpu.memory_space<vmem>>, %arg6: memref<1x1x32x64xbf16, #tpu.memory_space<vmem>>, %arg7: memref<32x64xf32, #tpu.memory_space<vmem>>) attributes {dimension_semantics = [#tpu.dimension_semantics<parallel>, #tpu.dimension_semantics<parallel>, #tpu.dimension_semantics<arbitrary>], iteration_bounds = array<i64: 2, 2, 4>, scalar_prefetch = 0 : i64, scratch_operands = 1 : i64, tpu.core_type = #tpu.core_type<tc>, window_params = [{transform_indices = @transform_0, window_bounds = array<i64: 1, 1, 1, 320, 147>}, {pipeline_mode = #tpu.pipeline_mode<synchronous>, transform_indices = @transform_1, window_bounds = array<i64: 147, 64>}, {pipeline_mode = #tpu.pipeline_mode<synchronous>, transform_indices = @transform_2, window_bounds = array<i64: 1, 64>}, {transform_indices = @transform_3, window_bounds = array<i64: 1, 1, 32, 64>}]} {
    %c0 = arith.constant 0 : index
    %c0_0 = arith.constant 0 : index
    %c0_1 = arith.constant 0 : index
    %c0_2 = arith.constant 0 : index
    %c0_3 = arith.constant 0 : index
    %0 = vector.load %arg3[%c0, %c0_0, %c0_1, %c0_2, %c0_3] : memref<1x1x1x320x147xbf16, #tpu.memory_space<vmem>>, vector<1x1x1x320x147xbf16>
    %1 = vector.shape_cast %0 : vector<1x1x1x320x147xbf16> to vector<320x147xbf16>
    %c0_4 = arith.constant 0 : index
    %c0_5 = arith.constant 0 : index
    %2 = vector.load %arg4[%c0_4, %c0_5] : memref<147x64xbf16, #tpu.memory_space<vmem>>, vector<147x64xbf16>
    %cst = arith.constant dense<0.000000e+00> : vector<320x64xf32>
    %3 = tpu.matmul %1, %2, %cst {dimension_numbers = #tpu.dot_dimension_numbers<[1], [0], [0], [1], [0, 0, 1, 1], [], []>} : vector<320x147xbf16>, vector<147x64xbf16>, vector<320x64xf32> -> vector<320x64xf32>
    %c0_6 = arith.constant 0 : index
    %c0_7 = arith.constant 0 : index
    %4 = vector.load %arg5[%c0_6, %c0_7] : memref<1x64xf32, #tpu.memory_space<vmem>>, vector<1x64xf32>
    %5 = vector.broadcast %4 : vector<1x64xf32> to vector<320x64xf32>
    %6 = arith.addf %3, %5 : vector<320x64xf32>
    %cst_8 = arith.constant 0.000000e+00 : f32
    %7 = vector.broadcast %cst_8 : f32 to vector<320x64xf32>
    %8 = arith.maximumf %6, %7 : vector<320x64xf32>
    %9 = vector.shape_cast %8 : vector<320x64xf32> to vector<4x5x16x64xf32>
    %10 = vector.extract_strided_slice %9 {offsets = [0, 0, 0, 0], sizes = [1, 5, 16, 64], strides = [1, 1, 1, 1]} : vector<4x5x16x64xf32> to vector<1x5x16x64xf32>
    %11 = vector.shape_cast %10 : vector<1x5x16x64xf32> to vector<5x16x64xf32>
    %12 = vector.extract_strided_slice %9 {offsets = [1, 0, 0, 0], sizes = [1, 5, 16, 64], strides = [1, 1, 1, 1]} : vector<4x5x16x64xf32> to vector<1x5x16x64xf32>
    %13 = vector.shape_cast %12 : vector<1x5x16x64xf32> to vector<5x16x64xf32>
    %14 = vector.extract_strided_slice %9 {offsets = [2, 0, 0, 0], sizes = [1, 5, 16, 64], strides = [1, 1, 1, 1]} : vector<4x5x16x64xf32> to vector<1x5x16x64xf32>
    %15 = vector.shape_cast %14 : vector<1x5x16x64xf32> to vector<5x16x64xf32>
    %16 = vector.extract_strided_slice %9 {offsets = [3, 0, 0, 0], sizes = [1, 5, 16, 64], strides = [1, 1, 1, 1]} : vector<4x5x16x64xf32> to vector<1x5x16x64xf32>
    %17 = vector.shape_cast %16 : vector<1x5x16x64xf32> to vector<5x16x64xf32>
    %18 = vector.extract_strided_slice %11 {offsets = [0, 0, 0], sizes = [4, 8, 64], strides = [1, 1, 1]} : vector<5x16x64xf32> to vector<4x8x64xf32>
    %19 = vector.extract_strided_slice %13 {offsets = [0, 0, 0], sizes = [4, 8, 64], strides = [1, 1, 1]} : vector<5x16x64xf32> to vector<4x8x64xf32>
    %20 = arith.maximumf %18, %19 : vector<4x8x64xf32>
    %21 = vector.extract_strided_slice %13 {offsets = [0, 1, 0], sizes = [4, 8, 64], strides = [1, 1, 1]} : vector<5x16x64xf32> to vector<4x8x64xf32>
    %22 = arith.maximumf %20, %21 : vector<4x8x64xf32>
    %23 = vector.extract_strided_slice %15 {offsets = [0, 0, 0], sizes = [4, 8, 64], strides = [1, 1, 1]} : vector<5x16x64xf32> to vector<4x8x64xf32>
    %24 = arith.maximumf %22, %23 : vector<4x8x64xf32>
    %25 = vector.extract_strided_slice %15 {offsets = [1, 0, 0], sizes = [4, 8, 64], strides = [1, 1, 1]} : vector<5x16x64xf32> to vector<4x8x64xf32>
    %26 = arith.maximumf %24, %25 : vector<4x8x64xf32>
    %27 = vector.extract_strided_slice %17 {offsets = [0, 0, 0], sizes = [4, 8, 64], strides = [1, 1, 1]} : vector<5x16x64xf32> to vector<4x8x64xf32>
    %28 = arith.maximumf %26, %27 : vector<4x8x64xf32>
    %29 = vector.extract_strided_slice %17 {offsets = [0, 1, 0], sizes = [4, 8, 64], strides = [1, 1, 1]} : vector<5x16x64xf32> to vector<4x8x64xf32>
    %30 = arith.maximumf %28, %29 : vector<4x8x64xf32>
    %31 = vector.extract_strided_slice %17 {offsets = [1, 0, 0], sizes = [4, 8, 64], strides = [1, 1, 1]} : vector<5x16x64xf32> to vector<4x8x64xf32>
    %32 = arith.maximumf %30, %31 : vector<4x8x64xf32>
    %33 = vector.extract_strided_slice %17 {offsets = [1, 1, 0], sizes = [4, 8, 64], strides = [1, 1, 1]} : vector<5x16x64xf32> to vector<4x8x64xf32>
    %34 = arith.maximumf %32, %33 : vector<4x8x64xf32>
    %35 = vector.shape_cast %34 : vector<4x8x64xf32> to vector<32x64xf32>
    %c0_i32 = arith.constant 0 : i32
    %36 = arith.cmpi eq, %arg2, %c0_i32 : i32
    %37 = arith.extui %36 : i1 to i32
    %c0_i32_9 = arith.constant 0 : i32
    %38 = arith.cmpi ne, %37, %c0_i32_9 : i32
    scf.if %38 {
      %cst_15 = arith.constant 0.000000e+00 : f32
      %45 = vector.broadcast %cst_15 : f32 to vector<32x64xf32>
      %c0_16 = arith.constant 0 : index
      %c0_17 = arith.constant 0 : index
      %46 = vector.load %arg7[%c0_16, %c0_17] : memref<32x64xf32, #tpu.memory_space<vmem>>, vector<32x64xf32>
      tpu.vector_store %arg7[%c0_16, %c0_17], %45 {strides = array<i32>} : memref<32x64xf32, #tpu.memory_space<vmem>>, vector<32x64xf32>,
    } else {
    }
    %c0_10 = arith.constant 0 : index
    %c0_11 = arith.constant 0 : index
    %39 = vector.load %arg7[%c0_10, %c0_11] : memref<32x64xf32, #tpu.memory_space<vmem>>, vector<32x64xf32>
    %40 = arith.addf %39, %35 : vector<32x64xf32>
    %c0_12 = arith.constant 0 : index
    %c0_13 = arith.constant 0 : index
    %41 = vector.load %arg7[%c0_12, %c0_13] : memref<32x64xf32, #tpu.memory_space<vmem>>, vector<32x64xf32>
    tpu.vector_store %arg7[%c0_12, %c0_13], %40 {strides = array<i32>} : memref<32x64xf32, #tpu.memory_space<vmem>>, vector<32x64xf32>,
    %c3_i32 = arith.constant 3 : i32
    %42 = arith.cmpi eq, %arg2, %c3_i32 : i32
    %43 = arith.extui %42 : i1 to i32
    %c0_i32_14 = arith.constant 0 : i32
    %44 = arith.cmpi ne, %43, %c0_i32_14 : i32
    scf.if %44 {
      %c0_15 = arith.constant 0 : index
      %c0_16 = arith.constant 0 : index
      %45 = vector.load %arg7[%c0_15, %c0_16] : memref<32x64xf32, #tpu.memory_space<vmem>>, vector<32x64xf32>
      %cst_17 = arith.constant 2.500000e-01 : f32
      %46 = vector.broadcast %cst_17 : f32 to vector<32x64xf32>
      %47 = arith.mulf %45, %46 : vector<32x64xf32>
      %48 = arith.truncf %47 : vector<32x64xf32> to vector<32x64xbf16>
      %c0_18 = arith.constant 0 : index
      %c0_19 = arith.constant 0 : index
      %c0_20 = arith.constant 0 : index
      %c0_21 = arith.constant 0 : index
      %49 = vector.load %arg6[%c0_18, %c0_19, %c0_20, %c0_21] : memref<1x1x32x64xbf16, #tpu.memory_space<vmem>>, vector<1x1x32x64xbf16>
      %50 = vector.shape_cast %49 : vector<1x1x32x64xbf16> to vector<32x64xbf16>
      %51 = vector.shape_cast %48 : vector<32x64xbf16> to vector<1x1x32x64xbf16>
      tpu.vector_store %arg6[%c0_18, %c0_19, %c0_20, %c0_21], %51 {strides = array<i32>} : memref<1x1x32x64xbf16, #tpu.memory_space<vmem>>, vector<1x1x32x64xbf16>,
    } else {
    }
    return
  }
  func.func @transform_0(%arg0: i32, %arg1: i32, %arg2: i32) -> (i32, i32, i32, i32, i32) {
    %c0_i32 = arith.constant 0 : i32
    %c0_i32_0 = arith.constant 0 : i32
    %c0_i32_1 = arith.constant 0 : i32
    return %arg0, %arg2, %arg1, %c0_i32, %c0_i32_0 : i32, i32, i32, i32, i32
  }
  func.func @transform_1(%arg0: i32, %arg1: i32, %arg2: i32) -> (i32, i32) {
    %c0_i32 = arith.constant 0 : i32
    %c0_i32_0 = arith.constant 0 : i32
    %c0_i32_1 = arith.constant 0 : i32
    return %c0_i32, %c0_i32_0 : i32, i32
  }
  func.func @transform_2(%arg0: i32, %arg1: i32, %arg2: i32) -> (i32, i32) {
    %c0_i32 = arith.constant 0 : i32
    %c0_i32_0 = arith.constant 0 : i32
    %c0_i32_1 = arith.constant 0 : i32
    return %c0_i32, %c0_i32_0 : i32, i32
  }
  func.func @transform_3(%arg0: i32, %arg1: i32, %arg2: i32) -> (i32, i32, i32, i32) {
    %c0_i32 = arith.constant 0 : i32
    %c0_i32_0 = arith.constant 0 : i32
    %c0_i32_1 = arith.constant 0 : i32
    return %arg0, %arg1, %c0_i32, %c0_i32_0 : i32, i32, i32, i32
  }
}

module attributes {stable_mosaic.version = 11 : i64} {
  func.func @_roi_head_kernel(%arg0: i32, %arg1: memref<3xi32, #tpu.memory_space<smem>>, %arg2: memref<1x224x64xbf16, #tpu.memory_space<vmem>>, %arg3: memref<1x64x64xbf16, #tpu.memory_space<vmem>>, %arg4: memref<64x128xf32, #tpu.memory_space<vmem>>, %arg5: memref<1x128xf32, #tpu.memory_space<vmem>>, %arg6: memref<1x4x128xf32, #tpu.memory_space<vmem>>) attributes {dimension_semantics = [#tpu.dimension_semantics<parallel>], iteration_bounds = array<i64: 3>, scalar_prefetch = 1 : i64, scratch_operands = 0 : i64, tpu.core_type = #tpu.core_type<tc>, window_params = [{transform_indices = @transform_0, window_bounds = array<i64: 1, 224, 64>}, {transform_indices = @transform_1, window_bounds = array<i64: 1, 64, 64>}, {pipeline_mode = #tpu.pipeline_mode<synchronous>, transform_indices = @transform_2, window_bounds = array<i64: 64, 128>}, {pipeline_mode = #tpu.pipeline_mode<synchronous>, transform_indices = @transform_3, window_bounds = array<i64: 1, 128>}, {transform_indices = @transform_4, window_bounds = array<i64: 1, 4, 128>}]} {
    %c0 = arith.constant 0 : index
    %c0_0 = arith.constant 0 : index
    %c0_1 = arith.constant 0 : index
    %0 = vector.load %arg2[%c0, %c0_0, %c0_1] : memref<1x224x64xbf16, #tpu.memory_space<vmem>>, vector<1x224x64xbf16>
    %1 = vector.shape_cast %0 : vector<1x224x64xbf16> to vector<224x64xbf16>
    %c0_2 = arith.constant 0 : index
    %c0_3 = arith.constant 0 : index
    %c0_4 = arith.constant 0 : index
    %2 = vector.load %arg3[%c0_2, %c0_3, %c0_4] : memref<1x64x64xbf16, #tpu.memory_space<vmem>>, vector<1x64x64xbf16>
    %3 = vector.shape_cast %2 : vector<1x64x64xbf16> to vector<64x64xbf16>
    %cst = arith.constant dense<0.000000e+00> : vector<224x64xf32>
    %4 = tpu.matmul %1, %3, %cst {dimension_numbers = #tpu.dot_dimension_numbers<[1], [0], [0], [1], [0, 0, 1, 1], [], []>} : vector<224x64xbf16>, vector<64x64xbf16>, vector<224x64xf32> -> vector<224x64xf32>
    %5 = vector.extract_strided_slice %4 {offsets = [0, 0], sizes = [56, 64], strides = [1, 1]} : vector<224x64xf32> to vector<56x64xf32>
    %cst_5 = arith.constant dense<0xFF800000> : vector<64xf32>
    %6 = vector.multi_reduction <maximumf>, %5, %cst_5 [0] : vector<56x64xf32> to vector<64xf32>
    %7 = vector.shape_cast %6 : vector<64xf32> to vector<1x64xf32>
    %8 = vector.extract_strided_slice %4 {offsets = [56, 0], sizes = [56, 64], strides = [1, 1]} : vector<224x64xf32> to vector<56x64xf32>
    %cst_6 = arith.constant dense<0xFF800000> : vector<64xf32>
    %9 = vector.multi_reduction <maximumf>, %8, %cst_6 [0] : vector<56x64xf32> to vector<64xf32>
    %10 = vector.shape_cast %9 : vector<64xf32> to vector<1x64xf32>
    %11 = vector.extract_strided_slice %4 {offsets = [112, 0], sizes = [56, 64], strides = [1, 1]} : vector<224x64xf32> to vector<56x64xf32>
    %cst_7 = arith.constant dense<0xFF800000> : vector<64xf32>
    %12 = vector.multi_reduction <maximumf>, %11, %cst_7 [0] : vector<56x64xf32> to vector<64xf32>
    %13 = vector.shape_cast %12 : vector<64xf32> to vector<1x64xf32>
    %14 = vector.extract_strided_slice %4 {offsets = [168, 0], sizes = [56, 64], strides = [1, 1]} : vector<224x64xf32> to vector<56x64xf32>
    %cst_8 = arith.constant dense<0xFF800000> : vector<64xf32>
    %15 = vector.multi_reduction <maximumf>, %14, %cst_8 [0] : vector<56x64xf32> to vector<64xf32>
    %16 = vector.shape_cast %15 : vector<64xf32> to vector<1x64xf32>
    %17 = tpu.concatenate %7, %10, %13, %16 in 0 : vector<1x64xf32>, vector<1x64xf32>, vector<1x64xf32>, vector<1x64xf32> -> vector<4x64xf32>
    %c0_9 = arith.constant 0 : index
    %c0_10 = arith.constant 0 : index
    %18 = vector.load %arg4[%c0_9, %c0_10] : memref<64x128xf32, #tpu.memory_space<vmem>>, vector<64x128xf32>
    %cst_11 = arith.constant dense<0.000000e+00> : vector<4x128xf32>
    %19 = tpu.matmul %17, %18, %cst_11 {dimension_numbers = #tpu.dot_dimension_numbers<[1], [0], [0], [1], [0, 0, 1, 1], [], []>} : vector<4x64xf32>, vector<64x128xf32>, vector<4x128xf32> -> vector<4x128xf32>
    %c0_12 = arith.constant 0 : index
    %c0_13 = arith.constant 0 : index
    %20 = vector.load %arg5[%c0_12, %c0_13] : memref<1x128xf32, #tpu.memory_space<vmem>>, vector<1x128xf32>
    %21 = vector.broadcast %20 : vector<1x128xf32> to vector<4x128xf32>
    %22 = arith.addf %19, %21 : vector<4x128xf32>
    %c0_14 = arith.constant 0 : index
    %c0_15 = arith.constant 0 : index
    %c0_16 = arith.constant 0 : index
    %23 = vector.load %arg6[%c0_14, %c0_15, %c0_16] : memref<1x4x128xf32, #tpu.memory_space<vmem>>, vector<1x4x128xf32>
    %24 = vector.shape_cast %23 : vector<1x4x128xf32> to vector<4x128xf32>
    %25 = vector.shape_cast %22 : vector<4x128xf32> to vector<1x4x128xf32>
    tpu.vector_store %arg6[%c0_14, %c0_15, %c0_16], %25 {strides = array<i32>} : memref<1x4x128xf32, #tpu.memory_space<vmem>>, vector<1x4x128xf32>,
    return
  }
  func.func @transform_0(%arg0: i32, %arg1: memref<3xi32, #tpu.memory_space<smem>>) -> (i32, i32, i32) {
    %c0_i32 = arith.constant 0 : i32
    %c0_i32_0 = arith.constant 0 : i32
    %c0_i32_1 = arith.constant 0 : i32
    return %arg0, %c0_i32, %c0_i32_0 : i32, i32, i32
  }
  func.func @transform_1(%arg0: i32, %arg1: memref<3xi32, #tpu.memory_space<smem>>) -> (i32, i32, i32) {
    %0 = arith.index_cast %arg0 : i32 to index
    %1 = memref.load %arg1[%0] : memref<3xi32, #tpu.memory_space<smem>>
    %c0_i32 = arith.constant 0 : i32
    %c0_i32_0 = arith.constant 0 : i32
    %c0_i32_1 = arith.constant 0 : i32
    return %1, %c0_i32, %c0_i32_0 : i32, i32, i32
  }
  func.func @transform_2(%arg0: i32, %arg1: memref<3xi32, #tpu.memory_space<smem>>) -> (i32, i32) {
    %c0_i32 = arith.constant 0 : i32
    %c0_i32_0 = arith.constant 0 : i32
    %c0_i32_1 = arith.constant 0 : i32
    return %c0_i32, %c0_i32_0 : i32, i32
  }
  func.func @transform_3(%arg0: i32, %arg1: memref<3xi32, #tpu.memory_space<smem>>) -> (i32, i32) {
    %c0_i32 = arith.constant 0 : i32
    %c0_i32_0 = arith.constant 0 : i32
    %c0_i32_1 = arith.constant 0 : i32
    return %c0_i32, %c0_i32_0 : i32, i32
  }
  func.func @transform_4(%arg0: i32, %arg1: memref<3xi32, #tpu.memory_space<smem>>) -> (i32, i32, i32) {
    %c0_i32 = arith.constant 0 : i32
    %c0_i32_0 = arith.constant 0 : i32
    %c0_i32_1 = arith.constant 0 : i32
    return %arg0, %c0_i32, %c0_i32_0 : i32, i32, i32
  }
}

</mosaic_0001>

<bundles_post_ra>
// kernel: custom-call.2
= control target key start
LH: loop header
LB: loop body
LE: loop exit
PB: predicated region body
PF: predicated region fallthrough
CT: control target
= control target key end

     0   :  { %s6_s0 = inlined_call_operand.vmem [shape: u32[3], index: 0, kind: output, shape index: {}]  }

// kernel: custom-call.12
= control target key start
LH: loop header
LB: loop body
LE: loop exit
PB: predicated region body
PF: predicated region fallthrough
CT: control target
= control target key end

     0   :  { %s6_s0 = inlined_call_operand.hbm [shape: f32[4,80], index: 0, kind: output, shape index: {}]  }

// kernel: detection_bbox_forward.2
= control target key start
LH: loop header
LB: loop body
LE: loop exit
PB: predicated region body
PF: predicated region fallthrough
CT: control target
= control target key end

     0   :  { %s1379_s12 = smov 0   ;;  %s1381_s13 = smov 0   ;;  %s1646_s0 = inlined_call_operand.vmem [shape: bf16[2,4,2,320,147], index: 0, kind: input, shape index: {}]   ;;  %s1647_s1 = inlined_call_operand.vmem [shape: bf16[147,64], index: 1, kind: input, shape index: {}]   ;;  %s1648_s2 = inlined_call_operand.vmem [shape: f32[1,64], index: 2, kind: input, shape index: {}]   ;;  %s1649_s3 = inlined_call_operand.vmem [shape: bf16[2,2,32,64], index: 3, kind: output, shape index: {}]  }
   0x1   :  { %s1383_s14 = smov 0   ;;  %s1385_s15 = smov 0  }
   0x2   :  { %s1387_s16 = smov 0   ;;  %s1389_s17 = smov 0  }
   0x3   :  { %s1391_s18 = smov 0  }
   0x4 LB: > { %s25_s19 = sadd.s32 1, %s1342_s15  ;;  %s28_s20 = sadd.s32 1, %s1346_s16  ;;  %s1354_s18 = sphi %s1391_s18, %s13_s18   ;;  %s1350_s17 = sphi %s1389_s17, %s1655_s17   ;;  %s1346_s16 = sphi %s1387_s16, %s1654_s16   ;;  %s1342_s15 = sphi %s1385_s15, %s1653_s15   ;;  %s1338_s14 = sphi %s1383_s14, %s1652_s14   ;;  %s1334_s13 = sphi %s1381_s13, %s1651_s13   ;;  %s1330_s12 = sphi %s1379_s12, %s1650_s12  }
   0x5   : > { %p26_p0 = scmp.ge.s32.totalorder %s25_s19, 4  ;;  %p1060_p1 = scmp.ge.s32.totalorder %s1354_s18, 1 }
   0x6   : > { %p170_p2 = scmp.lt.s32.totalorder %s1354_s18, 17  ;;  %s32_s21 = sadd.s32 1, %s1350_s17 }
   0x7   : > { %s1657_s19 = smov (%p26_p0, %s25_s19), 0  ;;  %s1659_s20 = smov (!%p26_p0, %s28_s20), %s1346_s16 }
   0x8   : > { %p171_p3 = pnand %p1060_p1, %p170_p2  ;;  %p30_p4 = scmp.ge.s32.totalorder %s1659_s20, 2 }
   0x9   : > { %v1230_v0 = vld [vmem:[%s1647_s1] sm:$0xff] (!%p171_p3)   ;;  %v1356_v1 = vmov (!%p171_p3), 0   ;;  %v1231_v2 = vld [vmem:[%s1647_s1 + $0x8] sm:$0xff] (!%p171_p3)   ;;  %v1232_v3 = vld [vmem:[%s1647_s1 + $0x10] sm:$0xff] (!%p171_p3)   ;;  %p206_p6 = scmp.lt.s32.totalorder (!%p171_p3), %s1338_s14, 1  ;;  %p208_p7 = scmp.lt.s32.totalorder (!%p171_p3), %s1330_s12, 3 }
   0xa   : > { %s1661_s20 = smov (%p30_p4, %s1659_s20), 0  ;;  %s1663_s21 = smov (!%p30_p4, %s32_s21), %s1350_s17 }
   0xb   : > { %p34_p5 = scmp.ge.s32.totalorder %s1663_s21, 2  ;;  %174 = sbr.rel (%p171_p3) target bundleno = 366 (0x16e), region = 32  ;;  %600 = vmatprep.subr.bf16.mxu0 (!%p171_p3), %v1356_v1  ;;  %1148 = vmatprep.subr.bf16.mxu1 (!%p171_p3), %v1356_v1  ;;  %v1233_v4 = vld [vmem:[%s1647_s1 + $0x18] sm:$0xff] (!%p171_p3)   ;;  %v1234_v5 = vld [vmem:[%s1647_s1 + $0x20] sm:$0xff] (!%p171_p3)   ;;  %v1235_v6 = vld [vmem:[%s1647_s1 + $0x28] sm:$0xff] (!%p171_p3)   ;;  %vm532_vm0 = vcmask (!%p171_p3), 154624  }
   0xc   : > { %601 = vmatpush1.bf16.msra.mxu0 (!%p171_p3), %v1230_v0  ;;  %1158 = vmatpush1.bf16.msra.mxu1 (!%p171_p3), %v1230_v0  ;;  %p210_p8 = scmp.lt.s32.totalorder (!%p171_p3), %s1334_s13, 1  ;;  %v1236_v8 = vld [vmem:[%s1647_s1 + $0x30] sm:$0xff] (!%p171_p3)   ;;  %vm593_vm1 = vcmask (!%p171_p3), 1040384   ;;  %v1237_v10 = vld [vmem:[%s1647_s1 + $0x38] sm:$0xff] (!%p171_p3)   ;;  %vm594_vm2 = vcmask (!%p171_p3), 1041408   ;;  %v1357_v11 = vmov (!%p171_p3), 65535  }
   0xd   : > { %s1665_s21 = smov (%p34_p5, %s1663_s21), 0  ;;  %602 = vmatprep.subr.bf16.mxu0 (!%p171_p3), %v1356_v1  ;;  %1149 = vmatprep.subr.bf16.mxu1 (!%p171_p3), %v1356_v1  ;;  %v595_v12 = vsel (!%p171_p3), %vm593_vm1, 4294967295, %v1357_v11  ;;  %v1238_v13 = vld [vmem:[%s1647_s1 + $0x40] sm:$0xff] (!%p171_p3)   ;;  %v1239_v14 = vld [vmem:[%s1647_s1 + $0x48] ss:$0 sps:$4 sm:$0x33] (!%p171_p3)  }
   0xe   : > { %v596_v15 = vsel (!%p171_p3), %vm594_vm2, %v595_v12, 0  ;;  %vm819_vm3 = vcmask (!%p171_p3), 1046528   ;;  %p1136_p9 = scmp.ne.s32.totalorder (!%p171_p3), %s1330_s12, 0 }
   0xf   : > { %v598_v16 = vand.u32 (!%p171_p3), %v1239_v14, %v596_v15 }
  0x10   : > { %603 = vmatpush1.bf16.msra.mxu0 (!%p171_p3), %v1231_v2  ;;  %1159 = vmatpush1.bf16.msra.mxu1 (!%p171_p3), %v1231_v2 }
  0x11   : > { %604 = vmatprep.subr.bf16.mxu0 (!%p171_p3), %v1356_v1  ;;  %1150 = vmatprep.subr.bf16.mxu1 (!%p171_p3), %v1356_v1 }
  0x12   : > { %s1667_s14 = smov (!%p206_p6, %s1338_s14), 1  ;;  %s1669_s13 = smov (!%p210_p8, %s1334_s13), 1 }
  0x13   : > { %s209_s28 = scalar_select %p208_p7, %s1330_s12, 3 }
  0x14   : > { %605 = vmatpush1.bf16.msra.mxu0 %v1232_v3  ;;  %1160 = vmatpush1.bf16.msra.mxu1 %v1232_v3  ;;  %s1063_s5 = sshll.u32 %s1667_s14, 3  ;;  %s1170_s6 = smul.u32 640, %s1667_s14  ;;  %vm898_vm4 = vcmask (!%p1136_p9), 523264  }
  0x15   : > { %606 = vmatprep.subr.bf16.mxu0 %v1356_v1  ;;  %1151 = vmatprep.subr.bf16.mxu1 %v1356_v1  ;;  %s1169_s4 = smul.u32 160, %s209_s28  ;;  %s1062_s10 = sshll.u32 %s1669_s13, 2 }
  0x16   : > { %s1168_s9 = smul.u32 80, %s1669_s13  ;;  %s225_s11 = sadd.s32 %s1063_s5, %s1062_s10 }
  0x17   : > { %s1064_s23 = sshll.u32 %s225_s11, 2 }
  0x18   : > { %607 = vmatpush1.bf16.msra.mxu0 %v1233_v4  ;;  %1161 = vmatpush1.bf16.msra.mxu1 %v1233_v4  ;;  %s214_s22 = sadd.s32 %s1169_s4, %s1168_s9  ;;  %s1461_s14 = scalar_lea.vmem %s1649_s3, %s1064_s23 }
  0x19   : > { %608 = vmatprep.subr.bf16.mxu0 %v1356_v1  ;;  %1152 = vmatprep.subr.bf16.mxu1 %v1356_v1  ;;  %s216_s24 = sadd.s32 %s1170_s6, %s214_s22 }
  0x1a   : > { %s1061_s13 = sshll.u32 %s216_s24, 2 }
  0x1b   : > { %s1471_s4 = scalar_lea.vmem %s1646_s0, %s1061_s13 }
  0x1c   : > { %609 = vmatpush1.bf16.msra.mxu0 %v1234_v5  ;;  %1162 = vmatpush1.bf16.msra.mxu1 %v1234_v5  ;;  %v1242_v7 = vld [vmem:[%s1471_s4 + $0x4] ss:$8 sps:$4 sm:$0xff]   ;;  %v1240_v17 = vld [vmem:[%s1471_s4] ss:$8 sps:$4 sm:$0xff]   ;;  %v1246_v19 = vld [vmem:[%s1471_s4 + $0x14] ss:$8 sps:$4 sm:$0xff]  }
  0x1d   : > { %610 = vmatprep.subr.bf16.mxu0 %v1356_v1  ;;  %1153 = vmatprep.subr.bf16.mxu1 %v1356_v1  ;;  %v1245_v9 = vld [vmem:[%s1471_s4 + $0xa4] ss:$8 sps:$4 sm:$0xff]   ;;  %v1243_v18 = vld [vmem:[%s1471_s4 + $0xa0] ss:$8 sps:$4 sm:$0xff]   ;;  %v1249_v20 = vld [vmem:[%s1471_s4 + $0xb4] ss:$8 sps:$4 sm:$0xff]  }
  0x1e   : > { %1116 = vmatprep.mubr.msk.bf16.mxu0 %vm532_vm0, %v1242_v7  ;;  %1126 = vmatprep.mubr.msk.bf16.mxu1 %vm532_vm0, %v1245_v9  ;;  %v1248_v21 = vld [vmem:[%s1471_s4 + $0x10] ss:$8 sps:$4 sm:$0xff]   ;;  %v1252_v23 = vld [vmem:[%s1471_s4 + $0x24] ss:$8 sps:$4 sm:$0xff]   ;;  %v1254_v25 = vld [vmem:[%s1471_s4 + $0x20] ss:$8 sps:$4 sm:$0xff]  }
  0x1f   : > { %v1251_v22 = vld [vmem:[%s1471_s4 + $0xb0] ss:$8 sps:$4 sm:$0xff]   ;;  %v1255_v24 = vld [vmem:[%s1471_s4 + $0xc4] ss:$8 sps:$4 sm:$0xff]   ;;  %v1257_v26 = vld [vmem:[%s1471_s4 + $0xc0] ss:$8 sps:$4 sm:$0xff]  }
  0x20   : > { %611 = vmatpush1.bf16.msra.mxu0 %v1235_v6  ;;  %1163 = vmatpush1.bf16.msra.mxu1 %v1235_v6  ;;  %v1258_v27 = vld [vmem:[%s1471_s4 + $0x34] ss:$8 sps:$4 sm:$0xff]   ;;  %v1260_v29 = vld [vmem:[%s1471_s4 + $0x30] ss:$8 sps:$4 sm:$0xff]   ;;  %v1264_v31 = vld [vmem:[%s1471_s4 + $0x44] ss:$8 sps:$4 sm:$0xff]  }
  0x21   : > { %612 = vmatprep.subr.bf16.mxu0 %v1356_v1  ;;  %1154 = vmatprep.subr.bf16.mxu1 %v1356_v1  ;;  %v1261_v28 = vld [vmem:[%s1471_s4 + $0xd4] ss:$8 sps:$4 sm:$0xff]   ;;  %v1263_v30 = vld [vmem:[%s1471_s4 + $0xd0] ss:$8 sps:$4 sm:$0xff]   ;;  %v1267_v32 = vld [vmem:[%s1471_s4 + $0xe4] ss:$8 sps:$4 sm:$0xff]  }
  0x22   : > { %v1266_v33 = vld [vmem:[%s1471_s4 + $0x40] ss:$8 sps:$4 sm:$0xff]   ;;  %v1270_v35 = vld [vmem:[%s1471_s4 + $0x54] ss:$8 sps:$4 sm:$0xff]   ;;  %v1272_v37 = vld [vmem:[%s1471_s4 + $0x50] ss:$8 sps:$4 sm:$0xff]  }
  0x23   : > { %v1269_v34 = vld [vmem:[%s1471_s4 + $0xe0] ss:$8 sps:$4 sm:$0xff]   ;;  %v1273_v36 = vld [vmem:[%s1471_s4 + $0xf4] ss:$8 sps:$4 sm:$0xff]   ;;  %v1275_v38 = vld [vmem:[%s1471_s4 + $0xf0] ss:$8 sps:$4 sm:$0xff]  }
  0x24   : > { %613 = vmatpush1.bf16.msra.mxu0 %v1236_v8  ;;  %1164 = vmatpush1.bf16.msra.mxu1 %v1236_v8  ;;  %v1276_v39 = vld [vmem:[%s1471_s4 + $0x64] ss:$8 sps:$4 sm:$0xff]   ;;  %v1278_v41 = vld [vmem:[%s1471_s4 + $0x60] ss:$8 sps:$4 sm:$0xff]   ;;  %v1282_v43 = vld [vmem:[%s1471_s4 + $0x74] ss:$8 sps:$4 sm:$0xff]  }
  0x25   : > { %614 = vmatprep.subr.bf16.mxu0 %v1356_v1  ;;  %1155 = vmatprep.subr.bf16.mxu1 %v1356_v1  ;;  %v1279_v40 = vld [vmem:[%s1471_s4 + $0x104] ss:$8 sps:$4 sm:$0xff]   ;;  %v1281_v42 = vld [vmem:[%s1471_s4 + $0x100] ss:$8 sps:$4 sm:$0xff]   ;;  %v1285_v44 = vld [vmem:[%s1471_s4 + $0x114] ss:$8 sps:$4 sm:$0xff]  }
  0x26   : > { %v1284_v45 = vld [vmem:[%s1471_s4 + $0x70] ss:$8 sps:$4 sm:$0xff]   ;;  %v1288_v47 = vld [vmem:[%s1471_s4 + $0x84] ss:$8 sps:$4 sm:$0xff]   ;;  %v1290_v49 = vld [vmem:[%s1471_s4 + $0x80] ss:$8 sps:$4 sm:$0xff]  }
  0x27   : > { %v1287_v46 = vld [vmem:[%s1471_s4 + $0x110] ss:$8 sps:$4 sm:$0xff]   ;;  %v1291_v48 = vld [vmem:[%s1471_s4 + $0x124] ss:$8 sps:$4 sm:$0xff]   ;;  %v1293_v50 = vld [vmem:[%s1471_s4 + $0x120] ss:$8 sps:$4 sm:$0xff]  }
  0x28   : > { %615 = vmatpush1.bf16.msra.mxu0 %v1237_v10  ;;  %1165 = vmatpush1.bf16.msra.mxu1 %v1237_v10  ;;  %v1294_v51 = vld [vmem:[%s1471_s4 + $0x134] ss:$8 sps:$4 sm:$0xff]   ;;  %v1296_v53 = vld [vmem:[%s1471_s4 + $0x130] ss:$8 sps:$4 sm:$0xff]  }
  0x29   : > { %616 = vmatprep.subr.bf16.mxu0 %v1356_v1  ;;  %1156 = vmatprep.subr.bf16.mxu1 %v1356_v1  ;;  %v1297_v52 = vld [vmem:[%s1471_s4 + $0x94] ss:$8 sps:$4 sm:$0xff]   ;;  %v1299_v54 = vld [vmem:[%s1471_s4 + $0x90] ss:$8 sps:$4 sm:$0xff]  }
  0x2c   : > { %617 = vmatpush1.bf16.msra.mxu0 %v1238_v13  ;;  %1166 = vmatpush1.bf16.msra.mxu1 %v1238_v13 }
  0x2d   : > { %618 = vmatprep.subr.bf16.mxu0 %v1356_v1  ;;  %1157 = vmatprep.subr.bf16.mxu1 %v1356_v1 }
  0x30   : > { %619 = vmatpush1.bf16.msra.mxu0 %v598_v16  ;;  %1167 = vmatpush1.bf16.msra.mxu1 %v598_v16 }
  0x33   : > { %633 = vmatmul.mubr.bf16.vlgmr.msra.gmra.mrb[0].mxu0 %v1240_v17  ;;  %705 = vmatmul.mubr.bf16.vlgmr.msra.gmra.mrb[0].mxu1 %v1243_v18 }
  0x34   : > { %1117 = vmatprep.mubr.msk.bf16.mxu0 %vm532_vm0, %v1246_v19  ;;  %1127 = vmatprep.mubr.msk.bf16.mxu1 %vm532_vm0, %v1249_v20 }
  0x3b   : > { %640 = vmatmul.mubr.bf16.gmra.mrb[4].mxu0 %v1248_v21  ;;  %712 = vmatmul.mubr.bf16.gmra.mrb[4].mxu1 %v1251_v22 }
  0x3c   : > { %1118 = vmatprep.mubr.msk.bf16.mxu0 %vm532_vm0, %v1252_v23  ;;  %1128 = vmatprep.mubr.msk.bf16.mxu1 %vm532_vm0, %v1255_v24 }
  0x43   : > { %647 = vmatmul.mubr.bf16.gmra.mrb[8].mxu0 %v1254_v25  ;;  %719 = vmatmul.mubr.bf16.gmra.mrb[8].mxu1 %v1257_v26 }
  0x44   : > { %1119 = vmatprep.mubr.msk.bf16.mxu0 %vm532_vm0, %v1258_v27  ;;  %1129 = vmatprep.mubr.msk.bf16.mxu1 %vm532_vm0, %v1261_v28 }
  0x4b   : > { %654 = vmatmul.mubr.bf16.gmra.mrb[12].mxu0 %v1260_v29  ;;  %726 = vmatmul.mubr.bf16.gmra.mrb[12].mxu1 %v1263_v30  ;;  %v1566_v29 = vld [vmem:[%s1648_s2] ss:$0 sm:$0xff] }
  0x4c   : > { %1120 = vmatprep.mubr.msk.bf16.mxu0 %vm532_vm0, %v1264_v31  ;;  %1130 = vmatprep.mubr.msk.bf16.mxu1 %vm532_vm0, %v1267_v32 }
  0x53   : > { %661 = vmatmul.mubr.bf16.gmra.mrb[16].mxu0 %v1266_v33  ;;  %733 = vmatmul.mubr.bf16.gmra.mrb[16].mxu1 %v1269_v34 }
  0x54   : > { %1121 = vmatprep.mubr.msk.bf16.mxu0 %vm532_vm0, %v1270_v35  ;;  %1131 = vmatprep.mubr.msk.bf16.mxu1 %vm532_vm0, %v1273_v36 }
  0x5b   : > { %667 = vmatmul.mubr.bf16.gmra.mrb[20].mxu0 %v1272_v37  ;;  %740 = vmatmul.mubr.bf16.gmra.mrb[20].mxu1 %v1275_v38 }
  0x5c   : > { %1122 = vmatprep.mubr.msk.bf16.mxu0 %vm532_vm0, %v1276_v39  ;;  %1132 = vmatprep.mubr.msk.bf16.mxu1 %vm532_vm0, %v1279_v40 }
  0x63   : > { %675 = vmatmul.mubr.bf16.gmra.mrb[24].mxu0 %v1278_v41  ;;  %748 = vmatmul.mubr.bf16.gmra.mrb[24].mxu1 %v1281_v42 }
  0x64   : > { %1123 = vmatprep.mubr.msk.bf16.mxu0 %vm532_vm0, %v1282_v43  ;;  %1133 = vmatprep.mubr.msk.bf16.mxu1 %vm532_vm0, %v1285_v44 }
  0x6b   : > { %683 = vmatmul.mubr.bf16.gmra.mrb[28].mxu0 %v1284_v45  ;;  %756 = vmatmul.mubr.bf16.gmra.mrb[28].mxu1 %v1287_v46 }
  0x6c   : > { %1124 = vmatprep.mubr.msk.bf16.mxu0 %vm532_vm0, %v1288_v47  ;;  %1134 = vmatprep.mubr.msk.bf16.mxu1 %vm532_vm0, %v1291_v48 }
  0x73   : > { %691 = vmatmul.mubr.bf16.gmra.mrb[32].mxu0 %v1290_v49  ;;  %764 = vmatmul.mubr.bf16.gmra.mrb[32].mxu1 %v1293_v50 }
  0x74   : > { %1135 = vmatprep.mubr.msk.bf16.mxu1 %vm532_vm0, %v1294_v51  ;;  %1125 = vmatprep.mubr.msk.bf16.mxu0 %vm532_vm0, %v1297_v52 }
  0x7b   : > { %772 = vmatmul.mubr.bf16.gmra.mrb[36].mxu1 %v1296_v53  ;;  %699 = vmatmul.mubr.bf16.gmra.mrb[36].mxu0 %v1299_v54 }
 0x106   : > { %v634_v55 = vpop.f32.mrb[0].mxu0  ;;  %v706_v56 = vpop.f32.mrb[0].mxu1 }
 0x107   : > { %v636_v57 = vpop.f32.mrb[1].mxu0  ;;  %v708_v58 = vpop.f32.mrb[1].mxu1  ;;  %v635_v32 = vadd.f32 %v1566_v29, %v634_v55  ;;  %v707_v50 = vadd.f32 %v1566_v29, %v706_v56 }
 0x108   : > { %v637_v59 = vpop.f32.mrb[2].mxu0  ;;  %v709_v60 = vpop.f32.mrb[2].mxu1 }
 0x109   : > { %v638_v61 = vpop.f32.mrb[3].mxu0  ;;  %v710_v62 = vpop.f32.mrb[3].mxu1  ;;  %v780_v39 = vmax.f32 %v635_v32, 0.0  ;;  %v792_v56 = vmax.f32 %v707_v50, 0.0 }
 0x10e   : > { %v641_v63 = vpop.f32.mrb[4].mxu0  ;;  %v713_v0 = vpop.f32.mrb[4].mxu1 }
 0x10f   : > { %v643_v1 = vpop.f32.mrb[5].mxu0  ;;  %v715_v2 = vpop.f32.mrb[5].mxu1  ;;  %v642_v51 = vadd.f32 %v1566_v29, %v641_v63  ;;  %v714_v57 = vadd.f32 %v1566_v29, %v713_v0 }
 0x110   : > { %v644_v3 = vpop.f32.mrb[6].mxu0  ;;  %v716_v4 = vpop.f32.mrb[6].mxu1 }
 0x111   : > { %v645_v5 = vpop.f32.mrb[7].mxu0  ;;  %v717_v6 = vpop.f32.mrb[7].mxu1  ;;  %v781_v4 = vmax.f32 %v642_v51, 0.0 }
 0x116   : > { %v1553_v7 = vpop.f32.mrb[8].mxu0  ;;  %v1555_v8 = vpop.f32.mrb[8].mxu1 }
 0x117   : > { %v650_v9 = vpop.f32.mrb[9].mxu0  ;;  %v722_v10 = vpop.f32.mrb[9].mxu1 }
 0x118   : > { %v651_v11 = vpop.f32.mrb[10].mxu0  ;;  %v723_v12 = vpop.f32.mrb[10].mxu1 }
 0x119   : > { %v652_v13 = vpop.f32.mrb[11].mxu0  ;;  %v724_v14 = vpop.f32.mrb[11].mxu1 }
 0x11e   : > { %v1557_v15 = vpop.f32.mrb[12].mxu0  ;;  %v1559_v16 = vpop.f32.mrb[12].mxu1 }
 0x11f   : > { %v657_v17 = vpop.f32.mrb[13].mxu0  ;;  %v729_v18 = vpop.f32.mrb[13].mxu1 }
 0x120   : > { %v658_v19 = vpop.f32.mrb[14].mxu0  ;;  %v730_v20 = vpop.f32.mrb[14].mxu1  ;;  %v793_v17 = vmax.f32 %v714_v57, 0.0 }
 0x121   : > { %v659_v21 = vpop.f32.mrb[15].mxu0  ;;  %v731_v22 = vpop.f32.mrb[15].mxu1 }
 0x122   : > { %v649_v21 = vadd.f32 %v1566_v29, %v1553_v7 }
 0x126   : > { %v662_v23 = vpop.f32.mrb[16].mxu0  ;;  %v1561_v24 = vpop.f32.mrb[16].mxu1 }
 0x127   : > { %v663_v25 = vpop.f32.mrb[17].mxu0  ;;  %v736_v26 = vpop.f32.mrb[17].mxu1 }
 0x128   : > { %v664_v27 = vpop.f32.mrb[18].mxu0  ;;  %v737_v28 = vpop.f32.mrb[18].mxu1 }
 0x129   : > { %v665_v30 = vpop.f32.mrb[19].mxu0  ;;  %v738_v31 = vpop.f32.mrb[19].mxu1  ;;  %v721_v28 = vadd.f32 %v1566_v29, %v1555_v8 }
 0x12e   : > { %v668_v33 = vpop.f32.mrb[20].mxu0  ;;  %v741_v34 = vpop.f32.mrb[20].mxu1 }
 0x12f   : > { %v669_v35 = vadd.f32 %v1566_v29, %v668_v33  ;;  %v670_v36 = vpop.f32.mrb[21].mxu0  ;;  %v742_v37 = vadd.f32 %v1566_v29, %v741_v34  ;;  %v743_v38 = vpop.f32.mrb[21].mxu1 }
 0x130   : > { %v671_v40 = vpop.f32.mrb[22].mxu0  ;;  %v744_v41 = vpop.f32.mrb[22].mxu1  ;;  %v782_v38 = vmax.f32 %v649_v21, 0.0 }
 0x131   : > { %v784_v42 = vmax.f32 %v669_v35, 0.0  ;;  %v797_v43 = vmax.f32 %v742_v37, 0.0  ;;  %v672_v44 = vadd.f32 %v1566_v29, %v671_v40  ;;  %v673_v45 = vpop.f32.mrb[23].mxu0  ;;  %v745_v46 = vadd.f32 %v1566_v29, %v744_v41  ;;  %v746_v47 = vpop.f32.mrb[23].mxu1 }
 0x133   : > { %v807_v48 = vmax.f32 %v780_v39, %v784_v42  ;;  %v785_v49 = vmax.f32 %v672_v44, 0.0  ;;  %v860_v52 = vrot.slane %v797_v43, 1  ;;  %v798_v53 = vmax.f32 %v745_v46, 0.0 }
 0x134   : > { %v820_v54 = vrot.slane %v784_v42, 1 }
 0x135   : > { %v821_v55 = vrot.slane %v785_v49, 1  ;;  %v861_v58 = vrot.slane %v798_v53, 1  ;;  %v794_v49 = vmax.f32 %v721_v28, 0.0 }
 0x136   : > { %v676_v59 = vpop.f32.mrb[24].mxu0  ;;  %v749_v60 = vpop.f32.mrb[24].mxu1 }
 0x137   : > { %v822_v61 = vsel %vm819_vm3, %v820_v54, %v821_v55  ;;  %v677_v62 = vadd.f32 %v1566_v29, %v676_v59  ;;  %v678_v1 = vpop.f32.mrb[25].mxu0  ;;  %v750_v2 = vadd.f32 %v1566_v29, %v749_v60  ;;  %v751_v3 = vpop.f32.mrb[25].mxu1  ;;  %v862_v5 = vsel %vm819_vm3, %v860_v52, %v861_v58 }
 0x138   : > { %v836_v63 = vmax.f32 %v807_v48, %v822_v61  ;;  %v679_v6 = vpop.f32.mrb[26].mxu0  ;;  %v752_v9 = vpop.f32.mrb[26].mxu1  ;;  %v656_v52 = vadd.f32 %v1566_v29, %v1557_v15 }
 0x139   : > { %v786_v10 = vmax.f32 %v677_v62, 0.0  ;;  %v799_v0 = vmax.f32 %v750_v2, 0.0  ;;  %v680_v11 = vadd.f32 %v1566_v29, %v679_v6  ;;  %v681_v12 = vpop.f32.mrb[27].mxu0  ;;  %v753_v13 = vadd.f32 %v1566_v29, %v752_v9  ;;  %v754_v14 = vpop.f32.mrb[27].mxu1 }
 0x13a   : > { %v840_v18 = vmax.f32 %v836_v63, %v792_v56  ;;  %v728_v62 = vadd.f32 %v1566_v29, %v1559_v16  ;;  %v783_v9 = vmax.f32 %v656_v52, 0.0 }
 0x13b   : > { %v808_v19 = vmax.f32 %v781_v4, %v786_v10  ;;  %v787_v20 = vmax.f32 %v680_v11, 0.0  ;;  %v863_v23 = vrot.slane %v799_v0, 1  ;;  %v800_v25 = vmax.f32 %v753_v13, 0.0 }
 0x13c   : > { %v844_v22 = vmax.f32 %v840_v18, %v793_v17  ;;  %v823_v26 = vrot.slane %v786_v10, 1  ;;  %v795_v21 = vmax.f32 %v728_v62, 0.0 }
 0x13d   : > { %v824_v27 = vrot.slane %v787_v20, 1  ;;  %v864_v31 = vrot.slane %v800_v25, 1 }
 0x13e   : > { %v848_v30 = vmax.f32 %v844_v22, %v797_v43  ;;  %v684_v32 = vpop.f32.mrb[28].mxu0  ;;  %v757_v33 = vpop.f32.mrb[28].mxu1 }
 0x13f   : > { %v825_v34 = vsel %vm819_vm3, %v823_v26, %v824_v27  ;;  %v685_v35 = vadd.f32 %v1566_v29, %v684_v32  ;;  %v686_v36 = vpop.f32.mrb[29].mxu0  ;;  %v758_v37 = vadd.f32 %v1566_v29, %v757_v33  ;;  %v759_v7 = vpop.f32.mrb[29].mxu1  ;;  %v1590_v41 = vsel %vm819_vm3, %v863_v23, %v864_v31 }
 0x140   : > { %v876_v39 = vmax.f32 %v848_v30, %v862_v5  ;;  %v837_v40 = vmax.f32 %v808_v19, %v825_v34  ;;  %v687_v42 = vpop.f32.mrb[30].mxu0  ;;  %v760_v8 = vpop.f32.mrb[30].mxu1  ;;  %v735_v34 = vadd.f32 %v1566_v29, %v1561_v24 }
 0x141   : > { %v788_v43 = vmax.f32 %v685_v35, 0.0  ;;  %v801_v44 = vmax.f32 %v758_v37, 0.0  ;;  %v688_v45 = vadd.f32 %v1566_v29, %v687_v42  ;;  %v689_v46 = vpop.f32.mrb[31].mxu0  ;;  %v761_v47 = vadd.f32 %v1566_v29, %v760_v8  ;;  %v762_v48 = vpop.f32.mrb[31].mxu1 }
 0x142   : > { %v1594_v50 = vmax.f32 %v876_v39, %v799_v0  ;;  %v841_v51 = vmax.f32 %v837_v40, %v793_v17 }
 0x143   : > { %v809_v53 = vmax.f32 %v782_v38, %v788_v43  ;;  %v789_v54 = vmax.f32 %v688_v45, 0.0  ;;  %v866_v58 = vrot.slane %v801_v44, 1  ;;  %v802_v59 = vmax.f32 %v761_v47, 0.0 }
 0x144   : > { %v845_v55 = vmax.f32 %v841_v51, %v794_v49  ;;  %v890_v57 = vmax.f32 %v1594_v50, %v1590_v41  ;;  %v826_v60 = vrot.slane %v788_v43, 1  ;;  %v796_v51 = vmax.f32 %v735_v34, 0.0 }
 0x145   : > { %v827_v61 = vrot.slane %v789_v54, 1  ;;  %v867_v2 = vrot.slane %v802_v59, 1 }
 0x146   : > { %v849_v1 = vmax.f32 %v845_v55, %v799_v0  ;;  %v692_v3 = vpop.f32.mrb[32].mxu0  ;;  %v765_v56 = vpop.f32.mrb[32].mxu1 }
 0x147   : > { %v828_v4 = vsel %vm819_vm3, %v826_v60, %v827_v61  ;;  %v693_v15 = vadd.f32 %v1566_v29, %v692_v3  ;;  %v694_v63 = vpop.f32.mrb[33].mxu0  ;;  %v766_v5 = vadd.f32 %v1566_v29, %v765_v56  ;;  %v767_v6 = vpop.f32.mrb[33].mxu1  ;;  %v868_v12 = vsel %vm819_vm3, %v866_v58, %v867_v2 }
 0x148   : > { %v877_v10 = vmax.f32 %v849_v1, %v1590_v41  ;;  %v838_v11 = vmax.f32 %v809_v53, %v828_v4  ;;  %v695_v13 = vpop.f32.mrb[34].mxu0  ;;  %v768_v16 = vpop.f32.mrb[34].mxu1 }
 0x149   : > { %v790_v0 = vmax.f32 %v693_v15, 0.0  ;;  %v803_v14 = vmax.f32 %v766_v5, 0.0  ;;  %v696_v17 = vadd.f32 %v1566_v29, %v695_v13  ;;  %v697_v18 = vpop.f32.mrb[35].mxu0  ;;  %v769_v19 = vadd.f32 %v1566_v29, %v768_v16  ;;  %v770_v20 = vpop.f32.mrb[35].mxu1 }
 0x14a   : > { %v881_v22 = vmax.f32 %v877_v10, %v801_v44  ;;  %v842_v23 = vmax.f32 %v838_v11, %v794_v49 }
 0x14b   : > { %v810_v25 = vmax.f32 %v783_v9, %v790_v0  ;;  %v791_v26 = vmax.f32 %v696_v17, 0.0  ;;  %v869_v30 = vrot.slane %v803_v14, 1  ;;  %v804_v31 = vmax.f32 %v769_v19, 0.0 }
 0x14c   : > { %v846_v27 = vmax.f32 %v842_v23, %v795_v21  ;;  %v891_v28 = vmax.f32 %v881_v22, %v868_v12  ;;  %v829_v32 = vrot.slane %v790_v0, 1 }
 0x14d   : > { %v830_v33 = vrot.slane %v791_v26, 1  ;;  %v870_v36 = vrot.slane %v804_v31, 1 }
 0x14e   : > { %v850_v35 = vmax.f32 %v846_v27, %v801_v44  ;;  %v773_v37 = vpop.f32.mrb[36].mxu1  ;;  %v700_v7 = vpop.f32.mrb[36].mxu0 }
 0x14f   : > { %v831_v38 = vsel %vm819_vm3, %v829_v32, %v830_v33  ;;  %v774_v39 = vadd.f32 %v1566_v29, %v773_v37  ;;  %v775_v40 = vpop.f32.mrb[37].mxu1  ;;  %v701_v42 = vpop.f32.mrb[37].mxu0  ;;  %v871_v45 = vsel %vm819_vm3, %v869_v30, %v870_v36 }
 0x150   : > { %v878_v8 = vmax.f32 %v850_v35, %v868_v12  ;;  %v839_v43 = vmax.f32 %v810_v25, %v831_v38  ;;  %v776_v46 = vpop.f32.mrb[38].mxu1  ;;  %v702_v47 = vpop.f32.mrb[38].mxu0 }
 0x151   : > { %v805_v48 = vmax.f32 %v774_v39, 0.0  ;;  %v777_v49 = vadd.f32 %v1566_v29, %v776_v46  ;;  %v778_v24 = vpop.f32.mrb[39].mxu1  ;;  %v703_v44 = vpop.f32.mrb[39].mxu0  ;;  %v1358_v29 = vmov (!%p1136_p9), 0.0  }
 0x152   : > { %v882_v52 = vmax.f32 %v878_v8, %v803_v14  ;;  %v843_v53 = vmax.f32 %v839_v43, %v795_v21  ;;  %899 = vst.msk [vmem:[#allocation2] sm:$0xff] (!%p1136_p9), %vm898_vm4, %v1358_v29  ;;  %900 = vst.msk [vmem:[#allocation2 + $0x8] sm:$0xff] (!%p1136_p9), %vm898_vm4, %v1358_v29 }
 0x153   : > { %v886_v54 = vrot.slane %v805_v48, 1  ;;  %v806_v55 = vmax.f32 %v777_v49, 0.0  ;;  %901 = vst.msk [vmem:[#allocation2 + $0x10] sm:$0xff] (!%p1136_p9), %vm898_vm4, %v1358_v29  ;;  %902 = vst.msk [vmem:[#allocation2 + $0x18] sm:$0xff] (!%p1136_p9), %vm898_vm4, %v1358_v29 }
 0x154   : > { %v847_v58 = vmax.f32 %v843_v53, %v796_v51  ;;  %v892_v59 = vmax.f32 %v882_v52, %v871_v45 }
 0x155   : > { %v887_v60 = vrot.slane %v806_v55, 1 }
 0x156   : > { %v851_v61 = vmax.f32 %v847_v58, %v803_v14  ;;  %897 = sbr.rel (%p1136_p9) target bundleno = 349 (0x15d), region = 36 }
 0x157   : > { %v888_v62 = vsel %vm819_vm3, %v886_v54, %v887_v60 }
 0x158   : > { %v879_v1 = vmax.f32 %v851_v61, %v871_v45 }
 0x15a   : > { %v883_v2 = vmax.f32 %v879_v1, %v805_v48 }
 0x15c   : > { %v893_v3 = vmax.f32 %v883_v2, %v888_v62 }
 0x15d PF: > { %v903_v56 = vld [vmem:[#allocation2] sm:$0xff]  ;;  %vm911_vm5 = vcmask 523264   ;;  %v904_v4 = vld [vmem:[#allocation2 + $0x8] sm:$0xff]  ;;  %v905_v15 = vld [vmem:[#allocation2 + $0x10] sm:$0xff]  ;;  %p1137_p10 = scmp.ne.s32.totalorder %s1330_s12, 3 }
 0x15e   : > { %v907_v63 = vadd.f32 %v903_v56, %v890_v57  ;;  %v908_v5 = vadd.f32 %v904_v4, %v891_v28  ;;  %v909_v6 = vadd.f32 %v905_v15, %v892_v59  ;;  %v906_v9 = vld [vmem:[#allocation2 + $0x18] sm:$0xff]  ;;  %vm944_vm6 = vcmask (!%p1137_p10), 519168  }
 0x15f   : > { %v910_v10 = vadd.f32 %v906_v9, %v893_v3  ;;  %919 = sbr.rel (%p1137_p10) target bundleno = 366 (0x16e), region = 40 }
 0x160   : > { %912 = vst.msk [vmem:[#allocation2] sm:$0xff] %vm911_vm5, %v907_v63  ;;  %913 = vst.msk [vmem:[#allocation2 + $0x8] sm:$0xff] %vm911_vm5, %v908_v5 }
 0x161   : > { %914 = vst.msk [vmem:[#allocation2 + $0x10] sm:$0xff] %vm911_vm5, %v909_v6  ;;  %915 = vst.msk [vmem:[#allocation2 + $0x18] sm:$0xff] %vm911_vm5, %v910_v10 }
 0x167   : > { %v920_v11 = vld [vmem:[#allocation2] sm:$0xff]  ;;  %v921_v12 = vld [vmem:[#allocation2 + $0x8] sm:$0xff] }
 0x168   : > { %v922_v13 = vld [vmem:[#allocation2 + $0x10] sm:$0xff]  ;;  %v924_v41 = vmul.f32 0.25, %v920_v11  ;;  %v925_v50 = vmul.f32 0.25, %v921_v12  ;;  %v923_v16 = vld [vmem:[#allocation2 + $0x18] sm:$0xff] }
 0x169   : > { %v926_v57 = vmul.f32 0.25, %v922_v13  ;;  %v927_v0 = vmul.f32 0.25, %v923_v16 }
 0x16a   : > { %v1144_v14 = vpack.c.bf16 %v924_v41, %v924_v41  ;;  %v1145_v17 = vpack.c.bf16 %v925_v50, %v925_v50 }
 0x16b   : > { %v1146_v18 = vpack.c.bf16 %v926_v57, %v926_v57  ;;  %v1147_v19 = vpack.c.bf16 %v927_v0, %v927_v0 }
 0x16c   : > { %945 = vst.msk [vmem:[%s1461_s14] sm:$0xf] %vm944_vm6, %v1144_v14  ;;  %946 = vst.msk [vmem:[%s1461_s14 + $0x4] sm:$0xf] %vm944_vm6, %v1145_v17 }
 0x16d   : > { %947 = vst.msk [vmem:[%s1461_s14 + $0x8] sm:$0xf] %vm944_vm6, %v1146_v18  ;;  %948 = vst.msk [vmem:[%s1461_s14 + $0xc] sm:$0xf] %vm944_vm6, %v1147_v19 }
 0x16e PF: > { %s13_s18 = sadd.s32 1, %s1354_s18   ;;  %s1650_s12 = smov %s1342_s15 }
 0x16f   : > { %p10_p11 = scmp.ge.s32.totalorder %s13_s18, 18   ;;  %s1651_s13 = smov %s1346_s16 }
 0x170   : > { %s1652_s14 = smov %s1350_s17  ;;  %s1653_s15 = smov %s1657_s19 }
 0x171   : > { %s1654_s16 = smov %s1661_s20  ;;  %s1655_s17 = smov %s1665_s21 }
 0x172   :  { %12 = sbr.rel (!%p10_p11) target bundleno = 4 (0x4), region = 70 }

// kernel: detection_bbox_forward.3
= control target key start
LH: loop header
LB: loop body
LE: loop exit
PB: predicated region body
PF: predicated region fallthrough
CT: control target
= control target key end

     0   :  { %s1133_s0 = inlined_call_operand.vmem [shape: s32[3], index: 0, kind: input, shape index: {}]   ;;  %s1134_s1 = inlined_call_operand.vmem [shape: bf16[3,224,64], index: 1, kind: input, shape index: {}]   ;;  %s1135_s2 = inlined_call_operand.vmem [shape: bf16[2,64,64], index: 2, kind: input, shape index: {}]   ;;  %s1136_s3 = inlined_call_operand.vmem [shape: f32[64,128], index: 3, kind: input, shape index: {}]   ;;  %s1137_s4 = inlined_call_operand.vmem [shape: f32[1,128], index: 4, kind: input, shape index: {}]   ;;  %s1138_s5 = inlined_call_operand.vmem [shape: f32[3,4,128], index: 5, kind: output, shape index: {}]  }
   0x1   :  { %s10_s20 = sshll.u32 %s1133_s0, 4  ;;  %s11_s20 = int_to_ptr.vmem [resolvable:$true] %s10_s20 }
   0x2   :  { %s964_s21 = scalar_lea.vmem %s11_s20, 16  ;;  %p969_p1 = scmp.lt.s32.totalorder %s11_s20, %s11_s20 }
   0x3   :  { %p965_p0 = scmp.ne.s32.totalorder %s11_s20, %s964_s21  ;;  %p970_p2 = scmp.lt.s32.totalorder %s964_s21, %s964_s21 }
   0x5   :  { %p971_p3 = por %p970_p2, %p969_p1 }
   0x7   :  { %p972_p4 = pnand %p971_p3, %p965_p0 }
   0x9   :  { %975 = shalt.err (!%p972_p4)  }
   0xa   :  { %s986_s22 = smov [#allocation3]  }
   0xb   :  { %13 = dma.vmem_to_smem %s11_s20, 16, %s986_s22, [#allocation2] }
   0xc   :  { %980 = dma.done.wait [#allocation2], 16 }
   0xd   :  { %981 = vsyncadd [#allocation2], 4294967280 }
   0xe   :  { %15 = sfence }
   0xf   :  { %s1023_s23 = smov 0  }
  0x10 LB: > { %s785_s0 = sadd.s32 4294967295, %s984_s23   ;;  %p789_p5 = scmp.ge.s32.totalorder %s984_s23, 1  ;;  %s984_s23 = sphi %s1023_s23, %s21_s23  }
  0x11   : > { %p183_p6 = scmp.lt.s32.totalorder %s984_s23, 4 }
  0x13   : > { %p184_p7 = pnand %p789_p5, %p183_p6 }
  0x14   : > { %s219_s24 = sld [smem:[#allocation3 + %s785_s0]] (!%p184_p7)  ;;  %p214_p8 = scmp.lt.s32.totalorder (!%p184_p7), %s785_s0, 2  ;;  %vm361_vm0 = vcmask (!%p184_p7), 523264   ;;  %v631_v18 = vld [vmem:[%s1136_s3] sm:$0xff] (!%p184_p7)  ;;  %v632_v19 = vld [vmem:[%s1136_s3 + $0x8] sm:$0xff] (!%p184_p7)  ;;  %v987_v21 = vmov (!%p184_p7), 0.0|0.0  }
  0x15   : > { %187 = sbr.rel (%p184_p7) target bundleno = 524 (0x20c), region = 36  ;;  %v914_v20 = vpack.c.bf16 (!%p184_p7), %v632_v19, %v631_v18  ;;  %v633_v22 = vld [vmem:[%s1136_s3 + $0x10] sm:$0xff] (!%p184_p7)  ;;  %v634_v23 = vld [vmem:[%s1136_s3 + $0x18] sm:$0xff] (!%p184_p7)  ;;  %v635_v25 = vld [vmem:[%s1136_s3 + $0x20] sm:$0xff] (!%p184_p7)  ;;  %vm988_vm1 = vmmov (!%p184_p7), 0   ;;  %v989_v31 = vmov (!%p184_p7), 0.0  }
  0x16   : > { %v917_v24 = vpack.c.bf16 (!%p184_p7), %v634_v23, %v633_v22  ;;  %v636_v26 = vld [vmem:[%s1136_s3 + $0x28] sm:$0xff] (!%p184_p7)  ;;  %v637_v28 = vld [vmem:[%s1136_s3 + $0x30] sm:$0xff] (!%p184_p7)  ;;  %v638_v29 = vld [vmem:[%s1136_s3 + $0x38] sm:$0xff] (!%p184_p7)  ;;  %vm625_vm2 = vcmask (!%p184_p7), 1040384   ;;  %vm627_vm3 = vcmask (!%p184_p7), 1041408   ;;  %vm629_vm4 = vcmask (!%p184_p7), 1042432  }
  0x17   : > { %v920_v27 = vpack.c.bf16 (!%p184_p7), %v636_v26, %v635_v25  ;;  %v923_v30 = vpack.c.bf16 (!%p184_p7), %v638_v29, %v637_v28 }
  0x1a   : > { %p220_p9 = scmp.lt.s32.totalorder (!%p184_p7), %s219_s24, 1 }
  0x1c   : > { %s1140_s0 = smov (!%p214_p8, %s785_s0), 2  ;;  %s1142_s24 = smov (!%p220_p9, %s219_s24), 1 }
  0x1d   : > { %s933_s25 = smul.u32 112, %s1140_s0  ;;  %s830_s29 = sshll.u32 %s1142_s24, 5 }
  0x1e   : > { %s224_s7 = scalar_lea.vmem %s1135_s2, %s830_s29 }
  0x1f   : > { %s1037_s28 = scalar_lea.vmem %s1134_s1, %s933_s25  ;;  %v946_v2 = vld [vmem:[%s224_s7] sm:$0xff]   ;;  %v947_v3 = vld [vmem:[%s224_s7 + $0x8] sm:$0xff]   ;;  %v948_v4 = vld [vmem:[%s224_s7 + $0x10] sm:$0xff]   ;;  %s793_s25 = sshll.u32 %s1140_s0, 2 }
  0x20   : > { %v950_v0 = vld [vmem:[%s1037_s28] sm:$0xff]   ;;  %858 = vmatprep.subr.bf16.mxu0 %v946_v2  ;;  %925 = vmatprep.subr.bf16.mxu1 %v946_v2  ;;  %v949_v5 = vld [vmem:[%s224_s7 + $0x18] sm:$0xff]   ;;  %v952_v6 = vld [vmem:[%s1037_s28 + $0x8] sm:$0xff]   ;;  %s229_s30 = scalar_lea.vmem %s1138_s5, %s793_s25 }
  0x21   : > { %v951_v1 = vld [vmem:[%s1037_s28 + $0x40] sm:$0xff]   ;;  %866 = vmatprep.mubr.msk.bf16.mxu0 %vm361_vm0, %v950_v0  ;;  %859 = vmatpush3.bf16.msra.mxu0 %v946_v2  ;;  %v953_v7 = vld [vmem:[%s1037_s28 + $0x48] sm:$0xff]   ;;  %v954_v8 = vld [vmem:[%s1037_s28 + $0x10] sm:$0xff]  }
  0x22   : > { %882 = vmatprep.mubr.msk.bf16.mxu1 %vm361_vm0, %v951_v1  ;;  %929 = vmatpush3.bf16.msra.mxu1 %v946_v2  ;;  %v955_v9 = vld [vmem:[%s1037_s28 + $0x50] sm:$0xff]   ;;  %v956_v10 = vld [vmem:[%s1037_s28 + $0x18] sm:$0xff]   ;;  %v958_v12 = vld [vmem:[%s1037_s28 + $0x20] sm:$0xff]  }
  0x23   : > { %860 = vmatprep.subr.bf16.mxu0 %v947_v3  ;;  %926 = vmatprep.subr.bf16.mxu1 %v947_v3  ;;  %v957_v11 = vld [vmem:[%s1037_s28 + $0x58] sm:$0xff]   ;;  %v959_v13 = vld [vmem:[%s1037_s28 + $0x60] sm:$0xff]   ;;  %v960_v14 = vld [vmem:[%s1037_s28 + $0x28] sm:$0xff]  }
  0x24   : > { %v961_v15 = vld [vmem:[%s1037_s28 + $0x68] sm:$0xff]   ;;  %v962_v16 = vld [vmem:[%s1037_s28 + $0x30] sm:$0xff]   ;;  %v963_v17 = vld [vmem:[%s1037_s28 + $0x38] sm:$0xff]  }
  0x25   : > { %861 = vmatpush3.bf16.msra.mxu0 %v947_v3 }
  0x26   : > { %930 = vmatpush3.bf16.msra.mxu1 %v947_v3  ;;  %862 = vmatprep.subr.bf16.mxu0 %v948_v4 }
  0x27   : > { %927 = vmatprep.subr.bf16.mxu1 %v948_v4 }
  0x29   : > { %863 = vmatpush3.bf16.msra.mxu0 %v948_v4 }
  0x2a   : > { %931 = vmatpush3.bf16.msra.mxu1 %v948_v4  ;;  %864 = vmatprep.subr.bf16.mxu0 %v949_v5 }
  0x2b   : > { %928 = vmatprep.subr.bf16.mxu1 %v949_v5 }
  0x2d   : > { %865 = vmatpush3.bf16.msra.mxu0 %v949_v5 }
  0x2e   : > { %932 = vmatpush3.bf16.msra.mxu1 %v949_v5 }
  0x2f   : > { %913 = vmatprep.subr.bf16.mxu1 %v987_v21 }
  0x30   : > { %867 = vmatmul.mubr.msk.bf16.vlgmr.msra.gmra.mrb[0].mxu0 %vm361_vm0, %v952_v6 }
  0x31   : > { %883 = vmatmul.mubr.msk.bf16.vlgmr.msra.gmra.mrb[0].mxu1 %vm361_vm0, %v953_v7  ;;  %870 = vmatprep.mubr.msk.bf16.mxu0 %vm361_vm0, %v954_v8 }
  0x32   : > { %886 = vmatprep.mubr.msk.bf16.mxu1 %vm361_vm0, %v955_v9  ;;  %915 = vmatpush3.bf16.msra.mxu1 %v914_v20 }
  0x33   : > { %916 = vmatprep.subr.bf16.mxu1 %v987_v21 }
  0x36   : > { %918 = vmatpush3.bf16.msra.mxu1 %v917_v24 }
  0x37   : > { %919 = vmatprep.subr.bf16.mxu1 %v987_v21 }
  0x38   : > { %871 = vmatmul.mubr.msk.bf16.gmra.mrb[4].mxu0 %vm361_vm0, %v956_v10 }
  0x39   : > { %887 = vmatmul.mubr.msk.bf16.gmra.mrb[4].mxu1 %vm361_vm0, %v957_v11  ;;  %874 = vmatprep.mubr.msk.bf16.mxu0 %vm361_vm0, %v958_v12 }
  0x3a   : > { %890 = vmatprep.mubr.msk.bf16.mxu1 %vm361_vm0, %v959_v13  ;;  %921 = vmatpush3.bf16.msra.mxu1 %v920_v27 }
  0x3b   : > { %922 = vmatprep.subr.bf16.mxu1 %v987_v21 }
  0x3e   : > { %924 = vmatpush3.bf16.msra.mxu1 %v923_v30 }
  0x40   : > { %875 = vmatmul.mubr.msk.bf16.gmra.mrb[8].mxu0 %vm361_vm0, %v960_v14 }
  0x41   : > { %891 = vmatmul.mubr.msk.bf16.gmra.mrb[8].mxu1 %vm361_vm0, %v961_v15  ;;  %878 = vmatprep.mubr.msk.bf16.mxu0 %vm361_vm0, %v962_v16 }
  0x42   : > { %910 = vmatprep.mubr.msk.f32.mxu1 %vm988_vm1, %v989_v31 }
  0x48   : > { %879 = vmatmul.mubr.msk.bf16.gmra.mrb[12].mxu0 %vm361_vm0, %v963_v17 }
 0x103   : > { %v868_v32 = vpop.f32.mrb[0].mxu0 }
 0x104   : > { %v884_v33 = vpop.f32.mrb[0].mxu1  ;;  %v438_v34 = vpop.f32.mrb[1].mxu0  ;;  %v551_v43 = vsel %vm361_vm0, %v868_v32, -inf }
 0x105   : > { %v502_v35 = vpop.f32.mrb[1].mxu1  ;;  %v869_v36 = vpop.f32.mrb[2].mxu0  ;;  %v549_v44 = vsel %vm361_vm0, %v438_v34, -inf  ;;  %v591_v26 = vsel %vm361_vm0, %v884_v33, -inf }
 0x106   : > { %v885_v37 = vpop.f32.mrb[2].mxu1  ;;  %v441_v38 = vpop.f32.mrb[3].mxu0  ;;  %v589_v40 = vsel %vm361_vm0, %v502_v35, -inf  ;;  %v552_v54 = vsel %vm361_vm0, %v869_v36, -inf }
 0x107   : > { %v505_v39 = vpop.f32.mrb[3].mxu1  ;;  %v550_v59 = vsel %vm361_vm0, %v441_v38, -inf  ;;  %v593_v36 = vsel %vm361_vm0, %v885_v37, -inf }
 0x108   : > { %v590_v48 = vsel %vm361_vm0, %v505_v39, -inf }
 0x10b   : > { %v872_v41 = vpop.f32.mrb[4].mxu0 }
 0x10c   : > { %v888_v42 = vpop.f32.mrb[4].mxu1  ;;  %v557_v45 = vsel %vm361_vm0, %v872_v41, -inf  ;;  %v454_v46 = vpop.f32.mrb[5].mxu0 }
 0x10d   : > { %v518_v47 = vpop.f32.mrb[5].mxu1  ;;  %v558_v49 = vmax.f32 %v551_v43, %v557_v45  ;;  %v553_v50 = vsel %vm361_vm0, %v454_v46, -inf  ;;  %v873_v52 = vpop.f32.mrb[6].mxu0  ;;  %v607_v0 = vsel %vm361_vm0, %v888_v42, -inf }
 0x10e   : > { %v595_v51 = vsel %vm361_vm0, %v518_v47, -inf  ;;  %v889_v53 = vpop.f32.mrb[6].mxu1  ;;  %v554_v55 = vmax.f32 %v549_v44, %v553_v50  ;;  %v457_v57 = vpop.f32.mrb[7].mxu0  ;;  %v568_v13 = vsel %vm361_vm0, %v873_v52, -inf }
 0x10f   : > { %v596_v56 = vmax.f32 %v589_v40, %v595_v51  ;;  %v521_v58 = vpop.f32.mrb[7].mxu1  ;;  %v560_v60 = vmax.f32 %v558_v49, %v552_v54  ;;  %v555_v61 = vsel %vm361_vm0, %v457_v57, -inf  ;;  %v608_v5 = vsel %vm361_vm0, %v889_v53, -inf }
 0x110   : > { %v556_v63 = vmax.f32 %v550_v59, %v555_v61  ;;  %v606_v9 = vsel %vm361_vm0, %v521_v58, -inf }
 0x111   : > { %v598_v62 = vmax.f32 %v596_v56, %v590_v48 }
 0x112   : > { %v559_v1 = vmax.f32 %v554_v55, %v556_v63 }
 0x113   : > { %v876_v2 = vpop.f32.mrb[8].mxu0 }
 0x114   : > { %v892_v3 = vpop.f32.mrb[8].mxu1  ;;  %v561_v4 = vmax.f32 %v559_v1, %v560_v60  ;;  %v470_v7 = vpop.f32.mrb[9].mxu0  ;;  %v571_v47 = vsel %vm361_vm0, %v876_v2, -inf }
 0x115   : > { %v612_v6 = vsel %vm361_vm0, %v892_v3, -inf  ;;  %v534_v8 = vpop.f32.mrb[9].mxu1  ;;  %v877_v11 = vpop.f32.mrb[10].mxu0  ;;  %v569_v31 = vsel %vm361_vm0, %v470_v7, -inf }
 0x116   : > { %v613_v10 = vmax.f32 %v607_v0, %v612_v6  ;;  %v893_v12 = vpop.f32.mrb[10].mxu1  ;;  %v609_v14 = vsel %vm361_vm0, %v534_v8, -inf  ;;  %v572_v15 = vsel %vm361_vm0, %v877_v11, -inf  ;;  %v473_v17 = vpop.f32.mrb[11].mxu0  ;;  %v562_v27 = vrot.slane %v561_v4, 4 }
 0x117   : > { %v614_v16 = vsel %vm361_vm0, %v893_v12, -inf  ;;  %v537_v18 = vpop.f32.mrb[11].mxu1  ;;  %v573_v19 = vmax.f32 %v568_v13, %v572_v15  ;;  %v570_v33 = vsel %vm361_vm0, %v473_v17, -inf  ;;  %v826_v11 = vld [vmem:[%s1137_s4] ss:$0 sm:$0xff] }
 0x118   : > { %v615_v20 = vmax.f32 %v608_v5, %v614_v16  ;;  %v610_v21 = vsel %vm361_vm0, %v537_v18, -inf  ;;  %v563_v44 = vmax.f32 %v561_v4, %v562_v27 }
 0x119   : > { %v611_v22 = vmax.f32 %v606_v9, %v610_v21 }
 0x11a   : > { %v617_v23 = vmax.f32 %v615_v20, %v609_v14  ;;  %v564_v37 = vrot.slane %v563_v44, 2 }
 0x11b   : > { %v616_v24 = vmax.f32 %v611_v22, %v613_v10  ;;  %v880_v25 = vpop.f32.mrb[12].mxu0 }
 0x11c   : > { %v587_v29 = vsel %vm361_vm0, %v880_v25, -inf  ;;  %v486_v30 = vpop.f32.mrb[13].mxu0  ;;  %v565_v57 = vmax.f32 %v563_v44, %v564_v37 }
 0x11d   : > { %v618_v28 = vmax.f32 %v616_v24, %v617_v23  ;;  %v592_v32 = vmax.f32 %v587_v29, %v591_v26  ;;  %v574_v34 = vsel %vm361_vm0, %v486_v30, -inf  ;;  %v881_v35 = vpop.f32.mrb[14].mxu0 }
 0x11e   : > { %v575_v39 = vmax.f32 %v569_v31, %v574_v34  ;;  %v588_v40 = vsel %vm361_vm0, %v881_v35, -inf  ;;  %v489_v41 = vpop.f32.mrb[15].mxu0  ;;  %v566_v0 = vrot.slane %v565_v57, 1 }
 0x11f   : > { %v619_v38 = vrot.slane %v618_v28, 4  ;;  %v594_v42 = vmax.f32 %v588_v40, %v593_v36  ;;  %v576_v43 = vsel %vm361_vm0, %v489_v41, -inf }
 0x120   : > { %v578_v45 = vmax.f32 %v573_v19, %v575_v39  ;;  %v577_v46 = vmax.f32 %v570_v33, %v576_v43 }
 0x121   : > { %v597_v48 = vmax.f32 %v592_v32, %v594_v42  ;;  %v620_v49 = vmax.f32 %v618_v28, %v619_v38 }
 0x122   : > { %v579_v50 = vmax.f32 %v577_v46, %v571_v47 }
 0x123   : > { %v599_v51 = vmax.f32 %v597_v48, %v598_v62  ;;  %v621_v54 = vrot.slane %v620_v49, 2  ;;  %v567_v62 = vmax.f32 %v565_v57, %v566_v0 }
 0x124   : > { %v580_v52 = vmax.f32 %v578_v45, %v579_v50 }
 0x125   : > { %v600_v53 = vrot.slane %v599_v51, 4  ;;  %v622_v60 = vmax.f32 %v620_v49, %v621_v54 }
 0x126   : > { %v581_v55 = vrot.slane %v580_v52, 4 }
 0x127   : > { %v601_v56 = vmax.f32 %v599_v51, %v600_v53  ;;  %v623_v3 = vrot.slane %v622_v60, 1 }
 0x128   : > { %v582_v58 = vmax.f32 %v580_v52, %v581_v55 }
 0x129   : > { %v602_v59 = vrot.slane %v601_v56, 2  ;;  %v624_v7 = vmax.f32 %v622_v60, %v623_v3 }
 0x12a   : > { %v583_v61 = vrot.slane %v582_v58, 2 }
 0x12b   : > { %v603_v63 = vmax.f32 %v601_v56, %v602_v59 }
 0x12c   : > { %v584_v1 = vmax.f32 %v582_v58, %v583_v61 }
 0x12d   : > { %v604_v2 = vrot.slane %v603_v63, 1 }
 0x12e   : > { %v585_v4 = vrot.slane %v584_v1, 1 }
 0x12f   : > { %v605_v6 = vmax.f32 %v603_v63, %v604_v2 }
 0x130   : > { %v586_v5 = vmax.f32 %v584_v1, %v585_v4 }
 0x132   : > { %v626_v8 = vsel %vm625_vm2, %v567_v62, %v586_v5 }
 0x133   : > { %v628_v9 = vsel %vm627_vm3, %v626_v8, %v605_v6 }
 0x134   : > { %v630_v10 = vsel %vm629_vm4, %v628_v9, %v624_v7 }
 0x135   : > { %911 = vmatmul.mubr.msk.f32.vlgmr.msra.gmra.mrb[12].mxu1 %vm361_vm0, %v630_v10 }
 0x208   : > { %v715_v12 = vpop.f32.mrb[12].mxu1 }
 0x209   : > { %v716_v13 = vadd.f32 %v826_v11, %v715_v12  ;;  %v912_v14 = vpop.f32.mrb[13].mxu1 }
 0x20b   : > { %719 = vst [vmem:[%s229_s30] sm:$0xf] %v716_v13 }
 0x20c PF: > { %s21_s23 = sadd.s32 1, %s984_s23  }
 0x20d   : > { %p18_p10 = scmp.ge.s32.totalorder %s21_s23, 5  }
 0x20f   :  { %20 = sbr.rel (!%p18_p10) target bundleno = 16 (0x10), region = 69 }

</bundles_post_ra>
